<compile_context>
chip_gen: v7x
topology: tpu7x:2x2x1
jax: 0.10.0
libtpu: 0.0.40
codegen_flags: <defaults>
</compile_context>

<pallas_src>
import functools
import math

import jax
import jax.numpy as jnp
from jax.experimental import pallas as pl

DIM = 32          # hidden size
NUM_HEADS = 4     # num_attn
D_K = DIM // NUM_HEADS
LN_EPS = 1e-5
NEG_INF = -1e9


# ---------------------------------------------------------------------------
# Fused kernel: self-MHA + LN, cross-MHA + LN, FFN + LN  (whole batch at once)
# ---------------------------------------------------------------------------
def fused_sga_kernel(x_ref, y_ref, xb_ref, yb_ref,
                     wqkv0_ref, wo0_ref, wq1_ref, wkv1_ref, wo1_ref,
                     w1_ref, w2_ref, vec_ref, out_ref,
                     *, dim, num_heads, d_k):
    f32 = jnp.float32
    x = x_ref[...].astype(f32)           # (B*Sx, D)
    y = y_ref[...].astype(f32)           # (B*Sy, D)
    vecs = vec_ref[...]                  # (13, 4*D) packed bias / LN vectors

    def vrow(i, width):                  # -> (1, width)
        return vecs[i:i + 1, 0:width]

    b_qkv0 = vrow(0, 3 * dim)
    b_o0   = vrow(1, dim)
    b_q1   = vrow(2, dim)
    b_kv1  = vrow(3, 2 * dim)
    b_o1   = vrow(4, dim)
    b_f1   = vrow(5, 4 * dim)
    b_f2   = vrow(6, dim)
    ln_g = (vrow(7, dim), vrow(9, dim), vrow(11, dim))
    ln_b = (vrow(8, dim), vrow(10, dim), vrow(12, dim))

    scale = 1.0 / math.sqrt(d_k)

    def layer_norm(z, g, bt):
        mu = jnp.mean(z, axis=-1, keepdims=True)
        var = jnp.mean((z - mu) ** 2, axis=-1, keepdims=True)
        return (z - mu) * jax.lax.rsqrt(var + LN_EPS) * g + bt

    def mha(q, k, v, wo, bo, bias):
        # q: (Mq, D), k/v: (Mk, D), bias: (Mq, Mk) additive (-1e9 where masked
        # or cross-batch).  Per-head loop: sublane-aligned row slices of Wo are
        # accumulated -> no head concat.
        proj = jnp.zeros((q.shape[0], dim), f32)
        for h in range(num_heads):                       # static unroll (H=4)
            sl = slice(h * d_k, (h + 1) * d_k)
            s = jnp.dot(q[:, sl], k[:, sl].T, preferred_element_type=f32) * scale
            s = s + bias
            s = s - jnp.max(s, axis=-1, keepdims=True)
            p = jnp.exp(s)
            p = p * pl.reciprocal(jnp.sum(p, axis=-1, keepdims=True), approx=True)
            ctx = jnp.dot(p, v[:, sl], preferred_element_type=f32)      # (Mq, d_k)
            proj = proj + jnp.dot(ctx, wo[sl, :], preferred_element_type=f32)
        return proj + bo

    # ---- stage 0: self-attention over x -----------------------------------
    qkv0 = jnp.dot(x, wqkv0_ref[...], preferred_element_type=f32) + b_qkv0   # (Mx, 3D)
    attn0 = mha(qkv0[:, 0:dim], qkv0[:, dim:2 * dim], qkv0[:, 2 * dim:3 * dim],
                wo0_ref[...], b_o0, xb_ref[...])
    x = layer_norm(x + attn0, ln_g[0], ln_b[0])

    # ---- stage 1: cross-attention (queries from x, keys/values from y) ----
    q1 = jnp.dot(x, wq1_ref[...], preferred_element_type=f32) + b_q1         # (Mx, D)
    kv1 = jnp.dot(y, wkv1_ref[...], preferred_element_type=f32) + b_kv1      # (My, 2D)
    attn1 = mha(q1, kv1[:, 0:dim], kv1[:, dim:2 * dim],
                wo1_ref[...], b_o1, yb_ref[...])
    x = layer_norm(x + attn1, ln_g[1], ln_b[1])

    # ---- stage 2: position-wise FFN ----------------------------------------
    h1 = jnp.maximum(jnp.dot(x, w1_ref[...], preferred_element_type=f32) + b_f1, 0.0)
    f = jnp.dot(h1, w2_ref[...], preferred_element_type=f32) + b_f2
    x = layer_norm(x + f, ln_g[2], ln_b[2])

    out_ref[...] = x.astype(out_ref.dtype)


# ---------------------------------------------------------------------------
# Parameter packing (done once, outside the per-call path)
# ---------------------------------------------------------------------------
def pack_params(params, dim):
    wq0, bq0, wk0, bk0, wv0, bv0, wo0, bo0 = params["mha0"]
    wq1, bq1, wk1, bk1, wv1, bv1, wo1, bo1 = params["mha1"]
    width = 4 * dim

    def pad(v):  # (1, n) -> (1, 4*dim)
        return jnp.pad(v, ((0, 0), (0, width - v.shape[1])))

    vecs = jnp.concatenate([
        pad(jnp.concatenate([bq0, bk0, bv0], axis=1)),   # 0: fused qkv bias (3D)
        pad(bo0),                                        # 1
        pad(bq1),                                        # 2
        pad(jnp.concatenate([bk1, bv1], axis=1)),        # 3: fused kv bias (2D)
        pad(bo1),                                        # 4
        pad(params["b1"]),                               # 5: FFN bias 1 (4D)
        pad(params["b2"]),                               # 6: FFN bias 2
        pad(params["ln0_g"]), pad(params["ln0_b"]),      # 7, 8
        pad(params["ln1_g"]), pad(params["ln1_b"]),      # 9, 10
        pad(params["ln2_g"]), pad(params["ln2_b"]),      # 11, 12
    ], axis=0)

    return dict(
        wqkv0=jnp.concatenate([wq0, wk0, wv0], axis=1),  # (D, 3D)
        wo0=wo0,
        wq1=wq1,
        wkv1=jnp.concatenate([wk1, wv1], axis=1),        # (D, 2D)
        wo1=wo1,
        w1=params["w1"], w2=params["w2"],
        vecs=vecs,
    )


def _attn_bias(key_mask_bool, batch, s_q, s_k):
    """Additive (B*Sq, B*Sk) bias: -1e9 on padded keys and cross-batch pairs."""
    qb = jnp.repeat(jnp.arange(batch), s_q)              # batch id per query row
    kb = jnp.repeat(jnp.arange(batch), s_k)              # batch id per key row
    cross = qb[:, None] != kb[None, :]
    keym = key_mask_bool.reshape(1, batch * s_k)
    return jnp.where(cross | keym, NEG_INF, 0.0).astype(jnp.float32)


# ---------------------------------------------------------------------------
# Wrapper
# ---------------------------------------------------------------------------
@jax.jit
def self_guided_attention(x, y, x_mask_bool, y_mask_bool, packed):
    B, Sx, D = x.shape
    Sy = y.shape[1]

    x_flat = x.reshape(B * Sx, D).astype(jnp.float32)
    y_flat = y.reshape(B * Sy, D).astype(jnp.float32)
    xb = _attn_bias(x_mask_bool, B, Sx, Sx)              # (B*Sx, B*Sx)
    yb = _attn_bias(y_mask_bool, B, Sx, Sy)              # (B*Sx, B*Sy)

    kernel = functools.partial(fused_sga_kernel, dim=D,
                               num_heads=NUM_HEADS, d_k=D // NUM_HEADS)

    # Single invocation (no grid): every operand is a whole-array VMEM block.
    out_flat = pl.pallas_call(
        kernel,
        out_shape=jax.ShapeDtypeStruct((B * Sx, D), jnp.float32),
    )(x_flat, y_flat, xb, yb,
      packed["wqkv0"], packed["wo0"], packed["wq1"], packed["wkv1"],
      packed["wo1"], packed["w1"], packed["w2"], packed["vecs"])

    return out_flat.reshape(B, Sx, D)


# ---------------------------------------------------------------------------
# Deterministic parameter init (PyTorch nn.Linear default: U(-1/sqrt(in), ..))
# ---------------------------------------------------------------------------
def init_linear(key, fan_in, fan_out):
    kw, kb = jax.random.split(key)
    bound = 1.0 / math.sqrt(fan_in)
    w = jax.random.uniform(kw, (fan_in, fan_out), jnp.float32, -bound, bound)
    b = jax.random.uniform(kb, (1, fan_out), jnp.float32, -bound, bound)
    return w, b


def init_mha(key, dim):
    keys = jax.random.split(key, 4)
    ps = []
    for k in keys:
        w, b = init_linear(k, dim, dim)
        ps.extend([w, b])
    return tuple(ps)  # wq, bq, wk, bk, wv, bv, wo, bo


def init_params(key, dim):
    k0, k1, k2, k3 = jax.random.split(key, 4)
    w1, b1 = init_linear(k2, dim, 4 * dim)
    w2, b2 = init_linear(k3, 4 * dim, dim)
    ones = jnp.ones((1, dim), jnp.float32)
    zeros = jnp.zeros((1, dim), jnp.float32)
    return dict(
        mha0=init_mha(k0, dim), mha1=init_mha(k1, dim),
        w1=w1, b1=b1, w2=w2, b2=b2,
        ln0_g=ones, ln0_b=zeros,
        ln1_g=ones, ln1_b=zeros,
        ln2_g=ones, ln2_b=zeros,
    )


# ---------------------------------------------------------------------------
# Pure-JAX reference (mirrors the PyTorch forward, dropout = identity)
# ---------------------------------------------------------------------------
def ref_layer_norm(x, g, b):
    mu = jnp.mean(x, axis=-1, keepdims=True)
    var = jnp.mean((x - mu) ** 2, axis=-1, keepdims=True)
    return (x - mu) / jnp.sqrt(var + LN_EPS) * g + b


def ref_mha(xq, xkv, mask_bool, p):
    wq, bq, wk, bk, wv, bv, wo, bo = p
    B, Sq, D = xq.shape
    Sk = xkv.shape[1]
    q = (xq @ wq + bq).reshape(B, Sq, NUM_HEADS, D_K).transpose(0, 2, 1, 3)
    k = (xkv @ wk + bk).reshape(B, Sk, NUM_HEADS, D_K).transpose(0, 2, 1, 3)
    v = (xkv @ wv + bv).reshape(B, Sk, NUM_HEADS, D_K).transpose(0, 2, 1, 3)
    scores = jnp.einsum("bhqd,bhkd->bhqk", q, k) / math.sqrt(D_K)
    scores = jnp.where(mask_bool[:, None, None, :], NEG_INF, scores)
    pa = jax.nn.softmax(scores, axis=-1)
    o = jnp.einsum("bhqk,bhkd->bhqd", pa, v).transpose(0, 2, 1, 3).reshape(B, Sq, D)
    return o @ wo + bo


def ref_forward(x, y, x_mask_bool, y_mask_bool, params):
    x = ref_layer_norm(x + ref_mha(x, x, x_mask_bool, params["mha0"]),
                       params["ln0_g"], params["ln0_b"])
    x = ref_layer_norm(x + ref_mha(x, y, y_mask_bool, params["mha1"]),
                       params["ln1_g"], params["ln1_b"])
    h = jnp.maximum(x @ params["w1"] + params["b1"], 0.0)
    f = h @ params["w2"] + params["b2"]
    return ref_layer_norm(x + f, params["ln2_g"], params["ln2_b"])


# ---------------------------------------------------------------------------
if __name__ == "__main__":
    key = jax.random.PRNGKey(0)
    kp, kx, ky = jax.random.split(key, 3)

    B, Sx, Sy = 2, 8, 8
    params = init_params(kp, DIM)
    packed = pack_params(params, DIM)

    x = jax.random.normal(kx, (B, Sx, DIM), jnp.float32)
    y = jax.random.normal(ky, (B, Sy, DIM), jnp.float32)

    # boolean padding masks (True == masked out), like MCAN; no fully-masked rows
    x_mask_bool = jnp.arange(Sx)[None, :] >= jnp.array([6, 8])[:, None]   # (B, Sx)
    y_mask_bool = jnp.arange(Sy)[None, :] >= jnp.array([5, 7])[:, None]   # (B, Sy)

    out = self_guided_attention(x, y, x_mask_bool, y_mask_bool, packed)
    out = jax.block_until_ready(out)

    ref = ref_forward(x, y, x_mask_bool, y_mask_bool, params)
    assert out.shape == (B, Sx, DIM)
    err = float(jnp.max(jnp.abs(out - ref)))
    assert err < 2e-3, f"mismatch vs pure-JAX reference (max abs err {err})"

    print("KERNEL_OK")
</pallas_src>

<mosaic_0001>
module attributes {stable_mosaic.version = 11 : i64} {
  func.func @fused_sga_kernel(%arg0: memref<16x32xf32, #tpu.memory_space<vmem>>, %arg1: memref<16x32xf32, #tpu.memory_space<vmem>>, %arg2: memref<16x16xf32, #tpu.memory_space<vmem>>, %arg3: memref<16x16xf32, #tpu.memory_space<vmem>>, %arg4: memref<32x96xf32, #tpu.memory_space<vmem>>, %arg5: memref<32x32xf32, #tpu.memory_space<vmem>>, %arg6: memref<32x32xf32, #tpu.memory_space<vmem>>, %arg7: memref<32x64xf32, #tpu.memory_space<vmem>>, %arg8: memref<32x32xf32, #tpu.memory_space<vmem>>, %arg9: memref<32x128xf32, #tpu.memory_space<vmem>>, %arg10: memref<128x32xf32, #tpu.memory_space<vmem>>, %arg11: memref<13x128xf32, #tpu.memory_space<vmem>>, %arg12: memref<16x32xf32, #tpu.memory_space<vmem>>) attributes {dimension_semantics = [], scalar_prefetch = 0 : i64, scratch_operands = 0 : i64, tpu.core_type = #tpu.core_type<tc>} {
    %c0 = arith.constant 0 : index
    %c0_0 = arith.constant 0 : index
    %0 = vector.load %arg0[%c0, %c0_0] : memref<16x32xf32, #tpu.memory_space<vmem>>, vector<16x32xf32>
    %c0_1 = arith.constant 0 : index
    %c0_2 = arith.constant 0 : index
    %1 = vector.load %arg1[%c0_1, %c0_2] : memref<16x32xf32, #tpu.memory_space<vmem>>, vector<16x32xf32>
    %c0_3 = arith.constant 0 : index
    %c0_4 = arith.constant 0 : index
    %2 = vector.load %arg11[%c0_3, %c0_4] : memref<13x128xf32, #tpu.memory_space<vmem>>, vector<13x128xf32>
    %3 = vector.extract_strided_slice %2 {offsets = [0, 0], sizes = [1, 96], strides = [1, 1]} : vector<13x128xf32> to vector<1x96xf32>
    %4 = vector.extract_strided_slice %2 {offsets = [1, 0], sizes = [1, 32], strides = [1, 1]} : vector<13x128xf32> to vector<1x32xf32>
    %5 = vector.extract_strided_slice %2 {offsets = [2, 0], sizes = [1, 32], strides = [1, 1]} : vector<13x128xf32> to vector<1x32xf32>
    %6 = vector.extract_strided_slice %2 {offsets = [3, 0], sizes = [1, 64], strides = [1, 1]} : vector<13x128xf32> to vector<1x64xf32>
    %7 = vector.extract_strided_slice %2 {offsets = [4, 0], sizes = [1, 32], strides = [1, 1]} : vector<13x128xf32> to vector<1x32xf32>
    %8 = vector.extract_strided_slice %2 {offsets = [5, 0], sizes = [1, 128], strides = [1, 1]} : vector<13x128xf32> to vector<1x128xf32>
    %9 = vector.extract_strided_slice %2 {offsets = [6, 0], sizes = [1, 32], strides = [1, 1]} : vector<13x128xf32> to vector<1x32xf32>
    %10 = vector.extract_strided_slice %2 {offsets = [7, 0], sizes = [1, 32], strides = [1, 1]} : vector<13x128xf32> to vector<1x32xf32>
    %11 = vector.extract_strided_slice %2 {offsets = [9, 0], sizes = [1, 32], strides = [1, 1]} : vector<13x128xf32> to vector<1x32xf32>
    %12 = vector.extract_strided_slice %2 {offsets = [11, 0], sizes = [1, 32], strides = [1, 1]} : vector<13x128xf32> to vector<1x32xf32>
    %13 = vector.extract_strided_slice %2 {offsets = [8, 0], sizes = [1, 32], strides = [1, 1]} : vector<13x128xf32> to vector<1x32xf32>
    %14 = vector.extract_strided_slice %2 {offsets = [10, 0], sizes = [1, 32], strides = [1, 1]} : vector<13x128xf32> to vector<1x32xf32>
    %15 = vector.extract_strided_slice %2 {offsets = [12, 0], sizes = [1, 32], strides = [1, 1]} : vector<13x128xf32> to vector<1x32xf32>
    %c0_5 = arith.constant 0 : index
    %c0_6 = arith.constant 0 : index
    %16 = vector.load %arg4[%c0_5, %c0_6] : memref<32x96xf32, #tpu.memory_space<vmem>>, vector<32x96xf32>
    %cst = arith.constant dense<0.000000e+00> : vector<16x96xf32>
    %17 = tpu.matmul %0, %16, %cst {dimension_numbers = #tpu.dot_dimension_numbers<[1], [0], [0], [1], [0, 0, 1, 1], [], []>} : vector<16x32xf32>, vector<32x96xf32>, vector<16x96xf32> -> vector<16x96xf32>
    %18 = vector.broadcast %3 : vector<1x96xf32> to vector<16x96xf32>
    %19 = arith.addf %17, %18 : vector<16x96xf32>
    %20 = vector.extract_strided_slice %19 {offsets = [0, 0], sizes = [16, 32], strides = [1, 1]} : vector<16x96xf32> to vector<16x32xf32>
    %21 = vector.extract_strided_slice %19 {offsets = [0, 32], sizes = [16, 32], strides = [1, 1]} : vector<16x96xf32> to vector<16x32xf32>
    %22 = vector.extract_strided_slice %19 {offsets = [0, 64], sizes = [16, 32], strides = [1, 1]} : vector<16x96xf32> to vector<16x32xf32>
    %c0_7 = arith.constant 0 : index
    %c0_8 = arith.constant 0 : index
    %23 = vector.load %arg5[%c0_7, %c0_8] : memref<32x32xf32, #tpu.memory_space<vmem>>, vector<32x32xf32>
    %c0_9 = arith.constant 0 : index
    %c0_10 = arith.constant 0 : index
    %24 = vector.load %arg2[%c0_9, %c0_10] : memref<16x16xf32, #tpu.memory_space<vmem>>, vector<16x16xf32>
    %cst_11 = arith.constant 0.000000e+00 : f32
    %25 = vector.broadcast %cst_11 : f32 to vector<16x32xf32>
    %26 = vector.extract_strided_slice %20 {offsets = [0, 0], sizes = [16, 8], strides = [1, 1]} : vector<16x32xf32> to vector<16x8xf32>
    %27 = vector.extract_strided_slice %21 {offsets = [0, 0], sizes = [16, 8], strides = [1, 1]} : vector<16x32xf32> to vector<16x8xf32>
    %28 = tpu.transpose %27, [1, 0] : vector<16x8xf32> -> vector<8x16xf32>
    %cst_12 = arith.constant dense<0.000000e+00> : vector<16x16xf32>
    %29 = tpu.matmul %26, %28, %cst_12 {dimension_numbers = #tpu.dot_dimension_numbers<[1], [0], [0], [1], [0, 0, 1, 1], [], []>} : vector<16x8xf32>, vector<8x16xf32>, vector<16x16xf32> -> vector<16x16xf32>
    %cst_13 = arith.constant 0.353553385 : f32
    %30 = vector.broadcast %cst_13 : f32 to vector<16x16xf32>
    %31 = arith.mulf %29, %30 : vector<16x16xf32>
    %32 = arith.addf %31, %24 : vector<16x16xf32>
    %cst_14 = arith.constant dense<0xFF800000> : vector<16xf32>
    %33 = vector.multi_reduction <maximumf>, %32, %cst_14 [1] : vector<16x16xf32> to vector<16xf32>
    %34 = vector.shape_cast %33 : vector<16xf32> to vector<16x1xf32>
    %35 = vector.broadcast %34 : vector<16x1xf32> to vector<16x16xf32>
    %36 = arith.subf %32, %35 : vector<16x16xf32>
    %37 = math.exp %36 : vector<16x16xf32>
    %cst_15 = arith.constant dense<0.000000e+00> : vector<16xf32>
    %38 = vector.multi_reduction <add>, %37, %cst_15 [1] : vector<16x16xf32> to vector<16xf32>
    %39 = vector.shape_cast %38 : vector<16xf32> to vector<16x1xf32>
    %40 = tpu.reciprocal %39 {approx = true} : vector<16x1xf32> -> vector<16x1xf32>
    %41 = vector.broadcast %40 : vector<16x1xf32> to vector<16x16xf32>
    %42 = arith.mulf %37, %41 : vector<16x16xf32>
    %43 = vector.extract_strided_slice %22 {offsets = [0, 0], sizes = [16, 8], strides = [1, 1]} : vector<16x32xf32> to vector<16x8xf32>
    %cst_16 = arith.constant dense<0.000000e+00> : vector<16x8xf32>
    %44 = tpu.matmul %42, %43, %cst_16 {dimension_numbers = #tpu.dot_dimension_numbers<[1], [0], [0], [1], [0, 0, 1, 1], [], []>} : vector<16x16xf32>, vector<16x8xf32>, vector<16x8xf32> -> vector<16x8xf32>
    %45 = vector.extract_strided_slice %23 {offsets = [0, 0], sizes = [8, 32], strides = [1, 1]} : vector<32x32xf32> to vector<8x32xf32>
    %cst_17 = arith.constant dense<0.000000e+00> : vector<16x32xf32>
    %46 = tpu.matmul %44, %45, %cst_17 {dimension_numbers = #tpu.dot_dimension_numbers<[1], [0], [0], [1], [0, 0, 1, 1], [], []>} : vector<16x8xf32>, vector<8x32xf32>, vector<16x32xf32> -> vector<16x32xf32>
    %47 = arith.addf %25, %46 : vector<16x32xf32>
    %48 = vector.extract_strided_slice %20 {offsets = [0, 8], sizes = [16, 8], strides = [1, 1]} : vector<16x32xf32> to vector<16x8xf32>
    %49 = vector.extract_strided_slice %21 {offsets = [0, 8], sizes = [16, 8], strides = [1, 1]} : vector<16x32xf32> to vector<16x8xf32>
    %50 = tpu.transpose %49, [1, 0] : vector<16x8xf32> -> vector<8x16xf32>
    %cst_18 = arith.constant dense<0.000000e+00> : vector<16x16xf32>
    %51 = tpu.matmul %48, %50, %cst_18 {dimension_numbers = #tpu.dot_dimension_numbers<[1], [0], [0], [1], [0, 0, 1, 1], [], []>} : vector<16x8xf32>, vector<8x16xf32>, vector<16x16xf32> -> vector<16x16xf32>
    %cst_19 = arith.constant 0.353553385 : f32
    %52 = vector.broadcast %cst_19 : f32 to vector<16x16xf32>
    %53 = arith.mulf %51, %52 : vector<16x16xf32>
    %54 = arith.addf %53, %24 : vector<16x16xf32>
    %cst_20 = arith.constant dense<0xFF800000> : vector<16xf32>
    %55 = vector.multi_reduction <maximumf>, %54, %cst_20 [1] : vector<16x16xf32> to vector<16xf32>
    %56 = vector.shape_cast %55 : vector<16xf32> to vector<16x1xf32>
    %57 = vector.broadcast %56 : vector<16x1xf32> to vector<16x16xf32>
    %58 = arith.subf %54, %57 : vector<16x16xf32>
    %59 = math.exp %58 : vector<16x16xf32>
    %cst_21 = arith.constant dense<0.000000e+00> : vector<16xf32>
    %60 = vector.multi_reduction <add>, %59, %cst_21 [1] : vector<16x16xf32> to vector<16xf32>
    %61 = vector.shape_cast %60 : vector<16xf32> to vector<16x1xf32>
    %62 = tpu.reciprocal %61 {approx = true} : vector<16x1xf32> -> vector<16x1xf32>
    %63 = vector.broadcast %62 : vector<16x1xf32> to vector<16x16xf32>
    %64 = arith.mulf %59, %63 : vector<16x16xf32>
    %65 = vector.extract_strided_slice %22 {offsets = [0, 8], sizes = [16, 8], strides = [1, 1]} : vector<16x32xf32> to vector<16x8xf32>
    %cst_22 = arith.constant dense<0.000000e+00> : vector<16x8xf32>
    %66 = tpu.matmul %64, %65, %cst_22 {dimension_numbers = #tpu.dot_dimension_numbers<[1], [0], [0], [1], [0, 0, 1, 1], [], []>} : vector<16x16xf32>, vector<16x8xf32>, vector<16x8xf32> -> vector<16x8xf32>
    %67 = vector.extract_strided_slice %23 {offsets = [8, 0], sizes = [8, 32], strides = [1, 1]} : vector<32x32xf32> to vector<8x32xf32>
    %cst_23 = arith.constant dense<0.000000e+00> : vector<16x32xf32>
    %68 = tpu.matmul %66, %67, %cst_23 {dimension_numbers = #tpu.dot_dimension_numbers<[1], [0], [0], [1], [0, 0, 1, 1], [], []>} : vector<16x8xf32>, vector<8x32xf32>, vector<16x32xf32> -> vector<16x32xf32>
    %69 = arith.addf %47, %68 : vector<16x32xf32>
    %70 = vector.extract_strided_slice %20 {offsets = [0, 16], sizes = [16, 8], strides = [1, 1]} : vector<16x32xf32> to vector<16x8xf32>
    %71 = vector.extract_strided_slice %21 {offsets = [0, 16], sizes = [16, 8], strides = [1, 1]} : vector<16x32xf32> to vector<16x8xf32>
    %72 = tpu.transpose %71, [1, 0] : vector<16x8xf32> -> vector<8x16xf32>
    %cst_24 = arith.constant dense<0.000000e+00> : vector<16x16xf32>
    %73 = tpu.matmul %70, %72, %cst_24 {dimension_numbers = #tpu.dot_dimension_numbers<[1], [0], [0], [1], [0, 0, 1, 1], [], []>} : vector<16x8xf32>, vector<8x16xf32>, vector<16x16xf32> -> vector<16x16xf32>
    %cst_25 = arith.constant 0.353553385 : f32
    %74 = vector.broadcast %cst_25 : f32 to vector<16x16xf32>
    %75 = arith.mulf %73, %74 : vector<16x16xf32>
    %76 = arith.addf %75, %24 : vector<16x16xf32>
    %cst_26 = arith.constant dense<0xFF800000> : vector<16xf32>
    %77 = vector.multi_reduction <maximumf>, %76, %cst_26 [1] : vector<16x16xf32> to vector<16xf32>
    %78 = vector.shape_cast %77 : vector<16xf32> to vector<16x1xf32>
    %79 = vector.broadcast %78 : vector<16x1xf32> to vector<16x16xf32>
    %80 = arith.subf %76, %79 : vector<16x16xf32>
    %81 = math.exp %80 : vector<16x16xf32>
    %cst_27 = arith.constant dense<0.000000e+00> : vector<16xf32>
    %82 = vector.multi_reduction <add>, %81, %cst_27 [1] : vector<16x16xf32> to vector<16xf32>
    %83 = vector.shape_cast %82 : vector<16xf32> to vector<16x1xf32>
    %84 = tpu.reciprocal %83 {approx = true} : vector<16x1xf32> -> vector<16x1xf32>
    %85 = vector.broadcast %84 : vector<16x1xf32> to vector<16x16xf32>
    %86 = arith.mulf %81, %85 : vector<16x16xf32>
    %87 = vector.extract_strided_slice %22 {offsets = [0, 16], sizes = [16, 8], strides = [1, 1]} : vector<16x32xf32> to vector<16x8xf32>
    %cst_28 = arith.constant dense<0.000000e+00> : vector<16x8xf32>
    %88 = tpu.matmul %86, %87, %cst_28 {dimension_numbers = #tpu.dot_dimension_numbers<[1], [0], [0], [1], [0, 0, 1, 1], [], []>} : vector<16x16xf32>, vector<16x8xf32>, vector<16x8xf32> -> vector<16x8xf32>
    %89 = vector.extract_strided_slice %23 {offsets = [16, 0], sizes = [8, 32], strides = [1, 1]} : vector<32x32xf32> to vector<8x32xf32>
    %cst_29 = arith.constant dense<0.000000e+00> : vector<16x32xf32>
    %90 = tpu.matmul %88, %89, %cst_29 {dimension_numbers = #tpu.dot_dimension_numbers<[1], [0], [0], [1], [0, 0, 1, 1], [], []>} : vector<16x8xf32>, vector<8x32xf32>, vector<16x32xf32> -> vector<16x32xf32>
    %91 = arith.addf %69, %90 : vector<16x32xf32>
    %92 = vector.extract_strided_slice %20 {offsets = [0, 24], sizes = [16, 8], strides = [1, 1]} : vector<16x32xf32> to vector<16x8xf32>
    %93 = vector.extract_strided_slice %21 {offsets = [0, 24], sizes = [16, 8], strides = [1, 1]} : vector<16x32xf32> to vector<16x8xf32>
    %94 = tpu.transpose %93, [1, 0] : vector<16x8xf32> -> vector<8x16xf32>
    %cst_30 = arith.constant dense<0.000000e+00> : vector<16x16xf32>
    %95 = tpu.matmul %92, %94, %cst_30 {dimension_numbers = #tpu.dot_dimension_numbers<[1], [0], [0], [1], [0, 0, 1, 1], [], []>} : vector<16x8xf32>, vector<8x16xf32>, vector<16x16xf32> -> vector<16x16xf32>
    %cst_31 = arith.constant 0.353553385 : f32
    %96 = vector.broadcast %cst_31 : f32 to vector<16x16xf32>
    %97 = arith.mulf %95, %96 : vector<16x16xf32>
    %98 = arith.addf %97, %24 : vector<16x16xf32>
    %cst_32 = arith.constant dense<0xFF800000> : vector<16xf32>
    %99 = vector.multi_reduction <maximumf>, %98, %cst_32 [1] : vector<16x16xf32> to vector<16xf32>
    %100 = vector.shape_cast %99 : vector<16xf32> to vector<16x1xf32>
    %101 = vector.broadcast %100 : vector<16x1xf32> to vector<16x16xf32>
    %102 = arith.subf %98, %101 : vector<16x16xf32>
    %103 = math.exp %102 : vector<16x16xf32>
    %cst_33 = arith.constant dense<0.000000e+00> : vector<16xf32>
    %104 = vector.multi_reduction <add>, %103, %cst_33 [1] : vector<16x16xf32> to vector<16xf32>
    %105 = vector.shape_cast %104 : vector<16xf32> to vector<16x1xf32>
    %106 = tpu.reciprocal %105 {approx = true} : vector<16x1xf32> -> vector<16x1xf32>
    %107 = vector.broadcast %106 : vector<16x1xf32> to vector<16x16xf32>
    %108 = arith.mulf %103, %107 : vector<16x16xf32>
    %109 = vector.extract_strided_slice %22 {offsets = [0, 24], sizes = [16, 8], strides = [1, 1]} : vector<16x32xf32> to vector<16x8xf32>
    %cst_34 = arith.constant dense<0.000000e+00> : vector<16x8xf32>
    %110 = tpu.matmul %108, %109, %cst_34 {dimension_numbers = #tpu.dot_dimension_numbers<[1], [0], [0], [1], [0, 0, 1, 1], [], []>} : vector<16x16xf32>, vector<16x8xf32>, vector<16x8xf32> -> vector<16x8xf32>
    %111 = vector.extract_strided_slice %23 {offsets = [24, 0], sizes = [8, 32], strides = [1, 1]} : vector<32x32xf32> to vector<8x32xf32>
    %cst_35 = arith.constant dense<0.000000e+00> : vector<16x32xf32>
    %112 = tpu.matmul %110, %111, %cst_35 {dimension_numbers = #tpu.dot_dimension_numbers<[1], [0], [0], [1], [0, 0, 1, 1], [], []>} : vector<16x8xf32>, vector<8x32xf32>, vector<16x32xf32> -> vector<16x32xf32>
    %113 = arith.addf %91, %112 : vector<16x32xf32>
    %114 = vector.broadcast %4 : vector<1x32xf32> to vector<16x32xf32>
    %115 = arith.addf %113, %114 : vector<16x32xf32>
    %116 = arith.addf %0, %115 : vector<16x32xf32>
    %cst_36 = arith.constant dense<0.000000e+00> : vector<16xf32>
    %117 = vector.multi_reduction <add>, %116, %cst_36 [1] : vector<16x32xf32> to vector<16xf32>
    %118 = vector.shape_cast %117 : vector<16xf32> to vector<16x1xf32>
    %cst_37 = arith.constant 3.200000e+01 : f32
    %119 = vector.broadcast %cst_37 : f32 to vector<16x1xf32>
    %120 = arith.divf %118, %119 : vector<16x1xf32>
    %121 = vector.broadcast %120 : vector<16x1xf32> to vector<16x32xf32>
    %122 = arith.subf %116, %121 : vector<16x32xf32>
    %123 = arith.mulf %122, %122 : vector<16x32xf32>
    %cst_38 = arith.constant dense<0.000000e+00> : vector<16xf32>
    %124 = vector.multi_reduction <add>, %123, %cst_38 [1] : vector<16x32xf32> to vector<16xf32>
    %125 = vector.shape_cast %124 : vector<16xf32> to vector<16x1xf32>
    %cst_39 = arith.constant 3.200000e+01 : f32
    %126 = vector.broadcast %cst_39 : f32 to vector<16x1xf32>
    %127 = arith.divf %125, %126 : vector<16x1xf32>
    %128 = vector.broadcast %120 : vector<16x1xf32> to vector<16x32xf32>
    %129 = arith.subf %116, %128 : vector<16x32xf32>
    %cst_40 = arith.constant 9.99999974E-6 : f32
    %130 = vector.broadcast %cst_40 : f32 to vector<16x1xf32>
    %131 = arith.addf %127, %130 : vector<16x1xf32>
    %132 = math.rsqrt %131 : vector<16x1xf32>
    %133 = vector.broadcast %132 : vector<16x1xf32> to vector<16x32xf32>
    %134 = arith.mulf %129, %133 : vector<16x32xf32>
    %135 = vector.broadcast %10 : vector<1x32xf32> to vector<16x32xf32>
    %136 = arith.mulf %134, %135 : vector<16x32xf32>
    %137 = vector.broadcast %13 : vector<1x32xf32> to vector<16x32xf32>
    %138 = arith.addf %136, %137 : vector<16x32xf32>
    %c0_41 = arith.constant 0 : index
    %c0_42 = arith.constant 0 : index
    %139 = vector.load %arg6[%c0_41, %c0_42] : memref<32x32xf32, #tpu.memory_space<vmem>>, vector<32x32xf32>
    %cst_43 = arith.constant dense<0.000000e+00> : vector<16x32xf32>
    %140 = tpu.matmul %138, %139, %cst_43 {dimension_numbers = #tpu.dot_dimension_numbers<[1], [0], [0], [1], [0, 0, 1, 1], [], []>} : vector<16x32xf32>, vector<32x32xf32>, vector<16x32xf32> -> vector<16x32xf32>
    %141 = vector.broadcast %5 : vector<1x32xf32> to vector<16x32xf32>
    %142 = arith.addf %140, %141 : vector<16x32xf32>
    %c0_44 = arith.constant 0 : index
    %c0_45 = arith.constant 0 : index
    %143 = vector.load %arg7[%c0_44, %c0_45] : memref<32x64xf32, #tpu.memory_space<vmem>>, vector<32x64xf32>
    %cst_46 = arith.constant dense<0.000000e+00> : vector<16x64xf32>
    %144 = tpu.matmul %1, %143, %cst_46 {dimension_numbers = #tpu.dot_dimension_numbers<[1], [0], [0], [1], [0, 0, 1, 1], [], []>} : vector<16x32xf32>, vector<32x64xf32>, vector<16x64xf32> -> vector<16x64xf32>
    %145 = vector.broadcast %6 : vector<1x64xf32> to vector<16x64xf32>
    %146 = arith.addf %144, %145 : vector<16x64xf32>
    %147 = vector.extract_strided_slice %146 {offsets = [0, 0], sizes = [16, 32], strides = [1, 1]} : vector<16x64xf32> to vector<16x32xf32>
    %148 = vector.extract_strided_slice %146 {offsets = [0, 32], sizes = [16, 32], strides = [1, 1]} : vector<16x64xf32> to vector<16x32xf32>
    %c0_47 = arith.constant 0 : index
    %c0_48 = arith.constant 0 : index
    %149 = vector.load %arg8[%c0_47, %c0_48] : memref<32x32xf32, #tpu.memory_space<vmem>>, vector<32x32xf32>
    %c0_49 = arith.constant 0 : index
    %c0_50 = arith.constant 0 : index
    %150 = vector.load %arg3[%c0_49, %c0_50] : memref<16x16xf32, #tpu.memory_space<vmem>>, vector<16x16xf32>
    %cst_51 = arith.constant 0.000000e+00 : f32
    %151 = vector.broadcast %cst_51 : f32 to vector<16x32xf32>
    %152 = vector.extract_strided_slice %142 {offsets = [0, 0], sizes = [16, 8], strides = [1, 1]} : vector<16x32xf32> to vector<16x8xf32>
    %153 = vector.extract_strided_slice %147 {offsets = [0, 0], sizes = [16, 8], strides = [1, 1]} : vector<16x32xf32> to vector<16x8xf32>
    %154 = tpu.transpose %153, [1, 0] : vector<16x8xf32> -> vector<8x16xf32>
    %cst_52 = arith.constant dense<0.000000e+00> : vector<16x16xf32>
    %155 = tpu.matmul %152, %154, %cst_52 {dimension_numbers = #tpu.dot_dimension_numbers<[1], [0], [0], [1], [0, 0, 1, 1], [], []>} : vector<16x8xf32>, vector<8x16xf32>, vector<16x16xf32> -> vector<16x16xf32>
    %cst_53 = arith.constant 0.353553385 : f32
    %156 = vector.broadcast %cst_53 : f32 to vector<16x16xf32>
    %157 = arith.mulf %155, %156 : vector<16x16xf32>
    %158 = arith.addf %157, %150 : vector<16x16xf32>
    %cst_54 = arith.constant dense<0xFF800000> : vector<16xf32>
    %159 = vector.multi_reduction <maximumf>, %158, %cst_54 [1] : vector<16x16xf32> to vector<16xf32>
    %160 = vector.shape_cast %159 : vector<16xf32> to vector<16x1xf32>
    %161 = vector.broadcast %160 : vector<16x1xf32> to vector<16x16xf32>
    %162 = arith.subf %158, %161 : vector<16x16xf32>
    %163 = math.exp %162 : vector<16x16xf32>
    %cst_55 = arith.constant dense<0.000000e+00> : vector<16xf32>
    %164 = vector.multi_reduction <add>, %163, %cst_55 [1] : vector<16x16xf32> to vector<16xf32>
    %165 = vector.shape_cast %164 : vector<16xf32> to vector<16x1xf32>
    %166 = tpu.reciprocal %165 {approx = true} : vector<16x1xf32> -> vector<16x1xf32>
    %167 = vector.broadcast %166 : vector<16x1xf32> to vector<16x16xf32>
    %168 = arith.mulf %163, %167 : vector<16x16xf32>
    %169 = vector.extract_strided_slice %148 {offsets = [0, 0], sizes = [16, 8], strides = [1, 1]} : vector<16x32xf32> to vector<16x8xf32>
    %cst_56 = arith.constant dense<0.000000e+00> : vector<16x8xf32>
    %170 = tpu.matmul %168, %169, %cst_56 {dimension_numbers = #tpu.dot_dimension_numbers<[1], [0], [0], [1], [0, 0, 1, 1], [], []>} : vector<16x16xf32>, vector<16x8xf32>, vector<16x8xf32> -> vector<16x8xf32>
    %171 = vector.extract_strided_slice %149 {offsets = [0, 0], sizes = [8, 32], strides = [1, 1]} : vector<32x32xf32> to vector<8x32xf32>
    %cst_57 = arith.constant dense<0.000000e+00> : vector<16x32xf32>
    %172 = tpu.matmul %170, %171, %cst_57 {dimension_numbers = #tpu.dot_dimension_numbers<[1], [0], [0], [1], [0, 0, 1, 1], [], []>} : vector<16x8xf32>, vector<8x32xf32>, vector<16x32xf32> -> vector<16x32xf32>
    %173 = arith.addf %151, %172 : vector<16x32xf32>
    %174 = vector.extract_strided_slice %142 {offsets = [0, 8], sizes = [16, 8], strides = [1, 1]} : vector<16x32xf32> to vector<16x8xf32>
    %175 = vector.extract_strided_slice %147 {offsets = [0, 8], sizes = [16, 8], strides = [1, 1]} : vector<16x32xf32> to vector<16x8xf32>
    %176 = tpu.transpose %175, [1, 0] : vector<16x8xf32> -> vector<8x16xf32>
    %cst_58 = arith.constant dense<0.000000e+00> : vector<16x16xf32>
    %177 = tpu.matmul %174, %176, %cst_58 {dimension_numbers = #tpu.dot_dimension_numbers<[1], [0], [0], [1], [0, 0, 1, 1], [], []>} : vector<16x8xf32>, vector<8x16xf32>, vector<16x16xf32> -> vector<16x16xf32>
    %cst_59 = arith.constant 0.353553385 : f32
    %178 = vector.broadcast %cst_59 : f32 to vector<16x16xf32>
    %179 = arith.mulf %177, %178 : vector<16x16xf32>
    %180 = arith.addf %179, %150 : vector<16x16xf32>
    %cst_60 = arith.constant dense<0xFF800000> : vector<16xf32>
    %181 = vector.multi_reduction <maximumf>, %180, %cst_60 [1] : vector<16x16xf32> to vector<16xf32>
    %182 = vector.shape_cast %181 : vector<16xf32> to vector<16x1xf32>
    %183 = vector.broadcast %182 : vector<16x1xf32> to vector<16x16xf32>
    %184 = arith.subf %180, %183 : vector<16x16xf32>
    %185 = math.exp %184 : vector<16x16xf32>
    %cst_61 = arith.constant dense<0.000000e+00> : vector<16xf32>
    %186 = vector.multi_reduction <add>, %185, %cst_61 [1] : vector<16x16xf32> to vector<16xf32>
    %187 = vector.shape_cast %186 : vector<16xf32> to vector<16x1xf32>
    %188 = tpu.reciprocal %187 {approx = true} : vector<16x1xf32> -> vector<16x1xf32>
    %189 = vector.broadcast %188 : vector<16x1xf32> to vector<16x16xf32>
    %190 = arith.mulf %185, %189 : vector<16x16xf32>
    %191 = vector.extract_strided_slice %148 {offsets = [0, 8], sizes = [16, 8], strides = [1, 1]} : vector<16x32xf32> to vector<16x8xf32>
    %cst_62 = arith.constant dense<0.000000e+00> : vector<16x8xf32>
    %192 = tpu.matmul %190, %191, %cst_62 {dimension_numbers = #tpu.dot_dimension_numbers<[1], [0], [0], [1], [0, 0, 1, 1], [], []>} : vector<16x16xf32>, vector<16x8xf32>, vector<16x8xf32> -> vector<16x8xf32>
    %193 = vector.extract_strided_slice %149 {offsets = [8, 0], sizes = [8, 32], strides = [1, 1]} : vector<32x32xf32> to vector<8x32xf32>
    %cst_63 = arith.constant dense<0.000000e+00> : vector<16x32xf32>
    %194 = tpu.matmul %192, %193, %cst_63 {dimension_numbers = #tpu.dot_dimension_numbers<[1], [0], [0], [1], [0, 0, 1, 1], [], []>} : vector<16x8xf32>, vector<8x32xf32>, vector<16x32xf32> -> vector<16x32xf32>
    %195 = arith.addf %173, %194 : vector<16x32xf32>
    %196 = vector.extract_strided_slice %142 {offsets = [0, 16], sizes = [16, 8], strides = [1, 1]} : vector<16x32xf32> to vector<16x8xf32>
    %197 = vector.extract_strided_slice %147 {offsets = [0, 16], sizes = [16, 8], strides = [1, 1]} : vector<16x32xf32> to vector<16x8xf32>
    %198 = tpu.transpose %197, [1, 0] : vector<16x8xf32> -> vector<8x16xf32>
    %cst_64 = arith.constant dense<0.000000e+00> : vector<16x16xf32>
    %199 = tpu.matmul %196, %198, %cst_64 {dimension_numbers = #tpu.dot_dimension_numbers<[1], [0], [0], [1], [0, 0, 1, 1], [], []>} : vector<16x8xf32>, vector<8x16xf32>, vector<16x16xf32> -> vector<16x16xf32>
    %cst_65 = arith.constant 0.353553385 : f32
    %200 = vector.broadcast %cst_65 : f32 to vector<16x16xf32>
    %201 = arith.mulf %199, %200 : vector<16x16xf32>
    %202 = arith.addf %201, %150 : vector<16x16xf32>
    %cst_66 = arith.constant dense<0xFF800000> : vector<16xf32>
    %203 = vector.multi_reduction <maximumf>, %202, %cst_66 [1] : vector<16x16xf32> to vector<16xf32>
    %204 = vector.shape_cast %203 : vector<16xf32> to vector<16x1xf32>
    %205 = vector.broadcast %204 : vector<16x1xf32> to vector<16x16xf32>
    %206 = arith.subf %202, %205 : vector<16x16xf32>
    %207 = math.exp %206 : vector<16x16xf32>
    %cst_67 = arith.constant dense<0.000000e+00> : vector<16xf32>
    %208 = vector.multi_reduction <add>, %207, %cst_67 [1] : vector<16x16xf32> to vector<16xf32>
    %209 = vector.shape_cast %208 : vector<16xf32> to vector<16x1xf32>
    %210 = tpu.reciprocal %209 {approx = true} : vector<16x1xf32> -> vector<16x1xf32>
    %211 = vector.broadcast %210 : vector<16x1xf32> to vector<16x16xf32>
    %212 = arith.mulf %207, %211 : vector<16x16xf32>
    %213 = vector.extract_strided_slice %148 {offsets = [0, 16], sizes = [16, 8], strides = [1, 1]} : vector<16x32xf32> to vector<16x8xf32>
    %cst_68 = arith.constant dense<0.000000e+00> : vector<16x8xf32>
    %214 = tpu.matmul %212, %213, %cst_68 {dimension_numbers = #tpu.dot_dimension_numbers<[1], [0], [0], [1], [0, 0, 1, 1], [], []>} : vector<16x16xf32>, vector<16x8xf32>, vector<16x8xf32> -> vector<16x8xf32>
    %215 = vector.extract_strided_slice %149 {offsets = [16, 0], sizes = [8, 32], strides = [1, 1]} : vector<32x32xf32> to vector<8x32xf32>
    %cst_69 = arith.constant dense<0.000000e+00> : vector<16x32xf32>
    %216 = tpu.matmul %214, %215, %cst_69 {dimension_numbers = #tpu.dot_dimension_numbers<[1], [0], [0], [1], [0, 0, 1, 1], [], []>} : vector<16x8xf32>, vector<8x32xf32>, vector<16x32xf32> -> vector<16x32xf32>
    %217 = arith.addf %195, %216 : vector<16x32xf32>
    %218 = vector.extract_strided_slice %142 {offsets = [0, 24], sizes = [16, 8], strides = [1, 1]} : vector<16x32xf32> to vector<16x8xf32>
    %219 = vector.extract_strided_slice %147 {offsets = [0, 24], sizes = [16, 8], strides = [1, 1]} : vector<16x32xf32> to vector<16x8xf32>
    %220 = tpu.transpose %219, [1, 0] : vector<16x8xf32> -> vector<8x16xf32>
    %cst_70 = arith.constant dense<0.000000e+00> : vector<16x16xf32>
    %221 = tpu.matmul %218, %220, %cst_70 {dimension_numbers = #tpu.dot_dimension_numbers<[1], [0], [0], [1], [0, 0, 1, 1], [], []>} : vector<16x8xf32>, vector<8x16xf32>, vector<16x16xf32> -> vector<16x16xf32>
    %cst_71 = arith.constant 0.353553385 : f32
    %222 = vector.broadcast %cst_71 : f32 to vector<16x16xf32>
    %223 = arith.mulf %221, %222 : vector<16x16xf32>
    %224 = arith.addf %223, %150 : vector<16x16xf32>
    %cst_72 = arith.constant dense<0xFF800000> : vector<16xf32>
    %225 = vector.multi_reduction <maximumf>, %224, %cst_72 [1] : vector<16x16xf32> to vector<16xf32>
    %226 = vector.shape_cast %225 : vector<16xf32> to vector<16x1xf32>
    %227 = vector.broadcast %226 : vector<16x1xf32> to vector<16x16xf32>
    %228 = arith.subf %224, %227 : vector<16x16xf32>
    %229 = math.exp %228 : vector<16x16xf32>
    %cst_73 = arith.constant dense<0.000000e+00> : vector<16xf32>
    %230 = vector.multi_reduction <add>, %229, %cst_73 [1] : vector<16x16xf32> to vector<16xf32>
    %231 = vector.shape_cast %230 : vector<16xf32> to vector<16x1xf32>
    %232 = tpu.reciprocal %231 {approx = true} : vector<16x1xf32> -> vector<16x1xf32>
    %233 = vector.broadcast %232 : vector<16x1xf32> to vector<16x16xf32>
    %234 = arith.mulf %229, %233 : vector<16x16xf32>
    %235 = vector.extract_strided_slice %148 {offsets = [0, 24], sizes = [16, 8], strides = [1, 1]} : vector<16x32xf32> to vector<16x8xf32>
    %cst_74 = arith.constant dense<0.000000e+00> : vector<16x8xf32>
    %236 = tpu.matmul %234, %235, %cst_74 {dimension_numbers = #tpu.dot_dimension_numbers<[1], [0], [0], [1], [0, 0, 1, 1], [], []>} : vector<16x16xf32>, vector<16x8xf32>, vector<16x8xf32> -> vector<16x8xf32>
    %237 = vector.extract_strided_slice %149 {offsets = [24, 0], sizes = [8, 32], strides = [1, 1]} : vector<32x32xf32> to vector<8x32xf32>
    %cst_75 = arith.constant dense<0.000000e+00> : vector<16x32xf32>
    %238 = tpu.matmul %236, %237, %cst_75 {dimension_numbers = #tpu.dot_dimension_numbers<[1], [0], [0], [1], [0, 0, 1, 1], [], []>} : vector<16x8xf32>, vector<8x32xf32>, vector<16x32xf32> -> vector<16x32xf32>
    %239 = arith.addf %217, %238 : vector<16x32xf32>
    %240 = vector.broadcast %7 : vector<1x32xf32> to vector<16x32xf32>
    %241 = arith.addf %239, %240 : vector<16x32xf32>
    %242 = arith.addf %138, %241 : vector<16x32xf32>
    %cst_76 = arith.constant dense<0.000000e+00> : vector<16xf32>
    %243 = vector.multi_reduction <add>, %242, %cst_76 [1] : vector<16x32xf32> to vector<16xf32>
    %244 = vector.shape_cast %243 : vector<16xf32> to vector<16x1xf32>
    %cst_77 = arith.constant 3.200000e+01 : f32
    %245 = vector.broadcast %cst_77 : f32 to vector<16x1xf32>
    %246 = arith.divf %244, %245 : vector<16x1xf32>
    %247 = vector.broadcast %246 : vector<16x1xf32> to vector<16x32xf32>
    %248 = arith.subf %242, %247 : vector<16x32xf32>
    %249 = arith.mulf %248, %248 : vector<16x32xf32>
    %cst_78 = arith.constant dense<0.000000e+00> : vector<16xf32>
    %250 = vector.multi_reduction <add>, %249, %cst_78 [1] : vector<16x32xf32> to vector<16xf32>
    %251 = vector.shape_cast %250 : vector<16xf32> to vector<16x1xf32>
    %cst_79 = arith.constant 3.200000e+01 : f32
    %252 = vector.broadcast %cst_79 : f32 to vector<16x1xf32>
    %253 = arith.divf %251, %252 : vector<16x1xf32>
    %254 = vector.broadcast %246 : vector<16x1xf32> to vector<16x32xf32>
    %255 = arith.subf %242, %254 : vector<16x32xf32>
    %cst_80 = arith.constant 9.99999974E-6 : f32
    %256 = vector.broadcast %cst_80 : f32 to vector<16x1xf32>
    %257 = arith.addf %253, %256 : vector<16x1xf32>
    %258 = math.rsqrt %257 : vector<16x1xf32>
    %259 = vector.broadcast %258 : vector<16x1xf32> to vector<16x32xf32>
    %260 = arith.mulf %255, %259 : vector<16x32xf32>
    %261 = vector.broadcast %11 : vector<1x32xf32> to vector<16x32xf32>
    %262 = arith.mulf %260, %261 : vector<16x32xf32>
    %263 = vector.broadcast %14 : vector<1x32xf32> to vector<16x32xf32>
    %264 = arith.addf %262, %263 : vector<16x32xf32>
    %c0_81 = arith.constant 0 : index
    %c0_82 = arith.constant 0 : index
    %265 = vector.load %arg9[%c0_81, %c0_82] : memref<32x128xf32, #tpu.memory_space<vmem>>, vector<32x128xf32>
    %cst_83 = arith.constant dense<0.000000e+00> : vector<16x128xf32>
    %266 = tpu.matmul %264, %265, %cst_83 {dimension_numbers = #tpu.dot_dimension_numbers<[1], [0], [0], [1], [0, 0, 1, 1], [], []>} : vector<16x32xf32>, vector<32x128xf32>, vector<16x128xf32> -> vector<16x128xf32>
    %267 = vector.broadcast %8 : vector<1x128xf32> to vector<16x128xf32>
    %268 = arith.addf %266, %267 : vector<16x128xf32>
    %cst_84 = arith.constant 0.000000e+00 : f32
    %269 = vector.broadcast %cst_84 : f32 to vector<16x128xf32>
    %270 = arith.maximumf %268, %269 : vector<16x128xf32>
    %c0_85 = arith.constant 0 : index
    %c0_86 = arith.constant 0 : index
    %271 = vector.load %arg10[%c0_85, %c0_86] : memref<128x32xf32, #tpu.memory_space<vmem>>, vector<128x32xf32>
    %cst_87 = arith.constant dense<0.000000e+00> : vector<16x32xf32>
    %272 = tpu.matmul %270, %271, %cst_87 {dimension_numbers = #tpu.dot_dimension_numbers<[1], [0], [0], [1], [0, 0, 1, 1], [], []>} : vector<16x128xf32>, vector<128x32xf32>, vector<16x32xf32> -> vector<16x32xf32>
    %273 = vector.broadcast %9 : vector<1x32xf32> to vector<16x32xf32>
    %274 = arith.addf %272, %273 : vector<16x32xf32>
    %275 = arith.addf %264, %274 : vector<16x32xf32>
    %cst_88 = arith.constant dense<0.000000e+00> : vector<16xf32>
    %276 = vector.multi_reduction <add>, %275, %cst_88 [1] : vector<16x32xf32> to vector<16xf32>
    %277 = vector.shape_cast %276 : vector<16xf32> to vector<16x1xf32>
    %cst_89 = arith.constant 3.200000e+01 : f32
    %278 = vector.broadcast %cst_89 : f32 to vector<16x1xf32>
    %279 = arith.divf %277, %278 : vector<16x1xf32>
    %280 = vector.broadcast %279 : vector<16x1xf32> to vector<16x32xf32>
    %281 = arith.subf %275, %280 : vector<16x32xf32>
    %282 = arith.mulf %281, %281 : vector<16x32xf32>
    %cst_90 = arith.constant dense<0.000000e+00> : vector<16xf32>
    %283 = vector.multi_reduction <add>, %282, %cst_90 [1] : vector<16x32xf32> to vector<16xf32>
    %284 = vector.shape_cast %283 : vector<16xf32> to vector<16x1xf32>
    %cst_91 = arith.constant 3.200000e+01 : f32
    %285 = vector.broadcast %cst_91 : f32 to vector<16x1xf32>
    %286 = arith.divf %284, %285 : vector<16x1xf32>
    %287 = vector.broadcast %279 : vector<16x1xf32> to vector<16x32xf32>
    %288 = arith.subf %275, %287 : vector<16x32xf32>
    %cst_92 = arith.constant 9.99999974E-6 : f32
    %289 = vector.broadcast %cst_92 : f32 to vector<16x1xf32>
    %290 = arith.addf %286, %289 : vector<16x1xf32>
    %291 = math.rsqrt %290 : vector<16x1xf32>
    %292 = vector.broadcast %291 : vector<16x1xf32> to vector<16x32xf32>
    %293 = arith.mulf %288, %292 : vector<16x32xf32>
    %294 = vector.broadcast %12 : vector<1x32xf32> to vector<16x32xf32>
    %295 = arith.mulf %293, %294 : vector<16x32xf32>
    %296 = vector.broadcast %15 : vector<1x32xf32> to vector<16x32xf32>
    %297 = arith.addf %295, %296 : vector<16x32xf32>
    %c0_93 = arith.constant 0 : index
    %c0_94 = arith.constant 0 : index
    %298 = vector.load %arg12[%c0_93, %c0_94] : memref<16x32xf32, #tpu.memory_space<vmem>>, vector<16x32xf32>
    tpu.vector_store %arg12[%c0_93, %c0_94], %297 {strides = array<i32>} : memref<16x32xf32, #tpu.memory_space<vmem>>, vector<16x32xf32>,
    return
  }
}

</mosaic_0001>

<bundles_post_ra>
// kernel: ne.15
= control target key start
LH: loop header
LB: loop body
LE: loop exit
PB: predicated region body
PF: predicated region fallthrough
CT: control target
= control target key end

     0   :  { %vm7_vm0 = vcmask 64512   ;;  %vm13_vm1 = vcmask 130112   ;;  %s39_s0 = inlined_call_operand.vmem [shape: s32[2,8], index: 0, kind: input, shape index: {}]   ;;  %s40_s1 = inlined_call_operand.vmem [shape: s32[16], index: 1, kind: output, shape index: {}]  }
   0x1   :  { %v4_v0 = vld [vmem:[%s39_s0] sm:$0x3]  ;;  %s22_s0 = smov 8  }
   0x2   :  { %5 = vst [vmem:[#allocation1] sm:$0x3] %v4_v0 }
   0x9   :  { %v10_v1 = vld [vmem:[#allocation1 + $0x1] sm:$0x1]   ;;  %v6_v2 = vld [vmem:[#allocation1] sm:$0x1]  }
   0xa   :  { %11 = vrot.lane.b32.xlu0 %v10_v1, %s22_s0  ;;  %8 = vst.msk [vmem:[#allocation0] sm:$0x1] %vm7_vm0, %v6_v2  }
  0x7c   :  { %v12_v3 = vpop.permute.xlu0 %11  }
  0x7d   :  { %14 = vst.msk [vmem:[#allocation0] sm:$0x1] %vm13_vm1, %v12_v3  }
  0x84   :  { %v18_v4 = vld [vmem:[#allocation0] sm:$0x1] }
  0x85   :  { %20 = vst [vmem:[%s40_s1] sm:$0x1] %v18_v4 }

// kernel: self_guided_attention.1
= control target key start
LH: loop header
LB: loop body
LE: loop exit
PB: predicated region body
PF: predicated region fallthrough
CT: control target
= control target key end

     0   :  { %17 = vsyncpa [#allocation3], 0  ;;  %s4390_s0 = inlined_call_operand.hbm [shape: f32[16,32], index: 0, kind: input, shape index: {}]   ;;  %s4391_s1 = inlined_call_operand.hbm [shape: f32[16,32], index: 1, kind: input, shape index: {}]   ;;  %s4392_s2 = inlined_call_operand.vmem [shape: f32[16,16], index: 2, kind: input, shape index: {}]   ;;  %s4393_s3 = inlined_call_operand.vmem [shape: f32[16,16], index: 3, kind: input, shape index: {}]   ;;  %s4394_s4 = inlined_call_operand.vmem [shape: f32[32,96], index: 4, kind: input, shape index: {}]   ;;  %s4395_s5 = inlined_call_operand.vmem [shape: f32[32,32], index: 5, kind: input, shape index: {}]   ;;  %s4396_s6 = inlined_call_operand.vmem [shape: f32[32,32], index: 6, kind: input, shape index: {}]   ;;  %s4397_s7 = inlined_call_operand.vmem [shape: f32[32,64], index: 7, kind: input, shape index: {}]   ;;  %s4398_s8 = inlined_call_operand.vmem [shape: f32[32,32], index: 8, kind: input, shape index: {}]   ;;  %s4399_s9 = inlined_call_operand.vmem [shape: f32[32,128], index: 9, kind: input, shape index: {}]   ;;  %s4400_s10 = inlined_call_operand.vmem [shape: f32[128,32], index: 10, kind: input, shape index: {}]   ;;  %s4401_s11 = inlined_call_operand.vmem [shape: f32[13,128], index: 11, kind: input, shape index: {}]   ;;  %s4402_s12 = inlined_call_operand.hbm [shape: f32[16,32], index: 12, kind: output, shape index: {}]  }
   0x1   :  { %18 = vsyncpa [#allocation6], 0 }
   0x2   :  { %19 = vsyncpa [#allocation4], 0  ;;  %s3808_s21 = smov [#allocation2]   ;;  %s3736_s25 = scalar_lea.hbm %s4390_s0, 256 }
   0x3   :  { %s25_s22 = sshll.u32 %s3808_s21, 4  ;;  %p3737_p0 = scmp.ne.s32.totalorder %s4390_s0, %s3736_s25  ;;  %s26_s22 = int_to_ptr.vmem [resolvable:$true] %s25_s22 }
   0x4   :  { %p3740_p1 = scmp.lt.u32.totalorder %s3736_s25, %s4390_s0 }
   0x6   :  { %p3742_p2 = pnand %p3740_p1, %p3737_p0 }
   0x8   :  { %3745 = shalt.err (!%p3742_p2)
}
   0x9   :  { %s3746_s30 = scalar_lea.vmem %s26_s22, 256  ;;  %p3751_p4 = scmp.lt.s32.totalorder %s26_s22, %s26_s22 }
   0xa   :  { %p3747_p3 = scmp.ne.s32.totalorder %s26_s22, %s3746_s30  ;;  %p3752_p5 = scmp.lt.s32.totalorder %s3746_s30, %s3746_s30 }
   0xc   :  { %p3753_p6 = por %p3752_p5, %p3751_p4 }
   0xe   :  { %p3754_p7 = pnand %p3753_p6, %p3747_p3 }
  0x10   :  { %3757 = shalt.err (!%p3754_p7)
}
  0x11   :  { %s3809_s13 = smov 128   ;;  %s3810_s14 = smov 8  }
  0x12   :  { %31 = dma.hbm_to_vmem [thread:$0]  %s4390_s0, 256, %s26_s22, [#allocation3], %s3809_s13, %s3809_s13, %s3810_s14  }
  0x13   :  { %s3811_s17 = smov [#allocation5]   ;;  %s3758_s21 = scalar_lea.hbm %s4391_s1, 256 }
  0x14   :  { %s37_s18 = sshll.u32 %s3811_s17, 4  ;;  %p3759_p8 = scmp.ne.s32.totalorder %s4391_s1, %s3758_s21  ;;  %s38_s18 = int_to_ptr.vmem [resolvable:$true] %s37_s18 }
  0x15   :  { %p3762_p9 = scmp.lt.u32.totalorder %s3758_s21, %s4391_s1 }
  0x17   :  { %p3764_p10 = pnand %p3762_p9, %p3759_p8 }
  0x19   :  { %3767 = shalt.err (!%p3764_p10)
}
  0x1a   :  { %s3768_s27 = scalar_lea.vmem %s38_s18, 256  ;;  %p3773_p12 = scmp.lt.s32.totalorder %s38_s18, %s38_s18 }
  0x1b   :  { %p3769_p11 = scmp.ne.s32.totalorder %s38_s18, %s3768_s27  ;;  %p3774_p13 = scmp.lt.s32.totalorder %s3768_s27, %s3768_s27 }
  0x1d   :  { %p3775_p0 = por %p3774_p13, %p3773_p12 }
  0x1f   :  { %p3776_p1 = pnand %p3775_p0, %p3769_p11 }
  0x21   :  { %3779 = shalt.err (!%p3776_p1)
}
  0x22   :  { %43 = dma.hbm_to_vmem [thread:$0]  %s4391_s1, 256, %s38_s18, [#allocation6], %s3809_s13, %s3809_s13, %s3810_s14  }
  0x23   :  { %3802 = dma.done.wait [#allocation3], 256  }
  0x24   :  { %3803 = vsyncadd [#allocation3], 4294967040 }
  0x25   :  { %3804 = dma.done.wait [#allocation6], 256  }
  0x26   :  { %3805 = vsyncadd [#allocation6], 4294967040  ;;  %vm84_vm0 = vcmask 261120   ;;  %v76_v0 = vld [vmem:[%s4394_s4] sm:$0xff]  ;;  %v77_v1 = vld [vmem:[%s4394_s4 + $0x8] sm:$0xff]  ;;  %v80_v8 = vlaneseq  ;;  %vm178_vm1 = vcmask 64512  }
  0x27   :  { %v78_v2 = vld [vmem:[%s4394_s4 + $0x10] sm:$0xff]  ;;  %v3412_v3 = vpack.c.bf16 %v77_v1, %v76_v0  ;;  %v79_v4 = vld [vmem:[%s4394_s4 + $0x18] sm:$0xff]  ;;  %v3931_v5 = vld [vmem:[#allocation2] sm:$0xff]  ;;  %s3812_s20 = smov 120   ;;  %s3813_s21 = smov 96   ;;  %vm266_vm3 = vcmask 130048  }
  0x28   :  { %v3416_v6 = vpack.c.bf16 %v79_v4, %v78_v2  ;;  %3189 = vmatprep.mubr.msk.f32.mxu1 %vm84_vm0, %v3931_v5  ;;  %v3935_v7 = vld [vmem:[#allocation2 + $0x8] sm:$0xff]  ;;  %v3939_v9 = vshrl.u32 %v80_v8, 7  ;;  %v3945_v11 = vld [vmem:[%s4401_s11] sm:$0xff]  ;;  %s3814_s23 = smov 88   ;;  %s3815_s24 = smov 112   ;;  %vm3976_vm2 = vmpackc.low %vm178_vm1, %vm178_vm1 }
  0x29   :  { %3413 = vmatprep.subr.bf16.mxu1 %v3412_v3  ;;  %s3816_s25 = smov 80   ;;  %v4001_v36 = vld [vmem:[%s4392_s2 + $0x8] sm:$0xff]  ;;  %v4006_v39 = vld [vmem:[%s4392_s2] sm:$0xff]  ;;  %s3817_s2 = smov 56  }
  0x2a   :  { %3415 = vmatpush3.bf16.msra.mxu1 %v3412_v3  ;;  %v82_v10 = vsub.s32 0, %v3939_v9  ;;  %s3818_s28 = smov 72   ;;  %s3819_s29 = smov 64   ;;  %v1542_v21 = vld [vmem:[%s4398_s8 + $0x8] sm:$0xff] }
  0x2b   :  { %3417 = vmatprep.subr.bf16.mxu1 %v3416_v6  ;;  %s3820_s30 = smov 104   ;;  %s3821_s15 = smov 48  }
  0x2c   :  { %v83_v12 = vrot.slane %v3945_v11, %v82_v10  ;;  %s3822_s16 = smov 40  }
  0x2e   :  { %3419 = vmatpush3.bf16.msra.mxu1 %v3416_v6 }
  0x31   :  { %3190 = vmatmul.mubr.msk.f32.vlgmr.msra.gmra.mrb[0].mxu1 %vm84_vm0, %v3935_v7 }
 0x104   :  { %v3191_v13 = vpop.f32.mrb[0].mxu1 }
 0x105   :  { %v3950_v14 = vadd.f32 %v3191_v13, %v83_v12  ;;  %v157_v15 = vpop.f32.mrb[1].mxu1 }
 0x106   :  { %v3952_v16 = vadd.f32 %v157_v15, %v83_v12 }
 0x108   :  { %376 = vrot.lane.b32.xlu1 %v3952_v16, %s3812_s20  ;;  %3196 = vmatprep.mubr.msk.f32.mxu1 %vm178_vm1, %v3952_v16  ;;  %v3960_v17 = vpack.i.bf16 %v3950_v14, %v3952_v16 }
 0x10a   :  { %3585 = vrot.lane.b32.xlu0 %v3960_v17, %s3813_s21 }
 0x10c   :  { %378 = vrot.lane.b32.xlu1 %v3950_v14, %s3812_s20 }
 0x10e   :  { %3590 = vrot.lane.b32.xlu0 %v3960_v17, %s3814_s23 }
 0x110   :  { %742 = vrot.lane.b32.xlu1 %v3952_v16, %s3815_s24 }
 0x112   :  { %3595 = vrot.lane.b32.xlu0 %v3960_v17, %s3816_s25 }
 0x116   :  { %744 = vrot.lane.b32.xlu0 %v3950_v14, %s3815_s24 }
 0x17a   :  { %v377_v28 = vpop.permute.xlu1 %376 }
 0x17c   :  { %v3586_v18 = vpop.permute.xlu0 %3585 }
 0x17d   :  { %v3588_v19 = vunpack.i.h.bf16 %v3586_v18  ;;  %v3587_v20 = vunpack.i.l.bf16 %v3586_v18 }
 0x17e   :  { %v379_v32 = vpop.permute.xlu1 %378 }
 0x17f   :  { %v3420_v22 = vpack.c.bf16 %v3588_v19, %v3587_v20 }
 0x180   :  { %v3591_v23 = vpop.permute.xlu0 %3590 }
 0x181   :  { %v3593_v24 = vunpack.i.h.bf16 %v3591_v23  ;;  %v3592_v25 = vunpack.i.l.bf16 %v3591_v23  ;;  %3422 = vmatprep.subr.msk.bf16.mxu1 %vm3976_vm2, %v3420_v22 }
 0x182   :  { %3425 = vmatpush3.bf16.xpose.msk.msra.mxu1 %vm3976_vm2, %v3420_v22  ;;  %v743_v33 = vpop.permute.xlu1 %742 }
 0x183   :  { %v3430_v26 = vpack.c.bf16 %v3593_v24, %v3592_v25 }
 0x184   :  { %v3596_v27 = vpop.permute.xlu0 %3595 }
 0x185   :  { %v3598_v29 = vunpack.i.h.bf16 %v3596_v27  ;;  %v3597_v30 = vunpack.i.l.bf16 %v3596_v27  ;;  %3432 = vmatprep.subr.msk.bf16.mxu1 %vm3976_vm2, %v3430_v26 }
 0x187   :  { %v3440_v31 = vpack.c.bf16 %v3598_v29, %v3597_v30 }
 0x188   :  { %v745_v34 = vpop.permute.xlu0 %744 }
 0x189   :  { %3197 = vmatmul.mubr.msk.f32.vlgmr.msra.gmra.mrb[2].mxu1 %vm178_vm1, %v3950_v14 }
 0x18a   :  { %3435 = vmatpush3.bf16.xpose.msk.msra.mxu1 %vm3976_vm2, %v3430_v26  ;;  %3210 = vmatprep.mubr.msk.f32.mxu1 %vm178_vm1, %v377_v28 }
 0x18b   :  { %3442 = vmatprep.subr.msk.bf16.mxu1 %vm3976_vm2, %v3440_v31 }
 0x191   :  { %3211 = vmatmul.mubr.msk.f32.vlgmr.msra.gmra.mrb[4].mxu1 %vm178_vm1, %v379_v32 }
 0x192   :  { %3445 = vmatpush3.bf16.xpose.msk.msra.mxu1 %vm3976_vm2, %v3440_v31  ;;  %3234 = vmatprep.mubr.msk.f32.mxu1 %vm178_vm1, %v743_v33 }
 0x199   :  { %3235 = vmatmul.mubr.msk.f32.vlgmr.msra.gmra.mrb[6].mxu1 %vm178_vm1, %v745_v34 }
 0x25c   :  { %v3198_v35 = vpop.f32.mrb[2].mxu1 }
 0x25d   :  { %v263_v37 = vmul.f32 0.35355338, %v3198_v35  ;;  %v253_v38 = vpop.f32.mrb[3].mxu1 }
 0x25e   :  { %v262_v40 = vmul.f32 0.35355338, %v253_v38 }
 0x25f   :  { %v265_v41 = vadd.f32 %v263_v37, %v4001_v36 }
 0x260   :  { %v264_v42 = vadd.f32 %v262_v40, %v4006_v39 }
 0x261   :  { %v270_v43 = vsel %vm266_vm3, %v265_v41, -inf }
 0x262   :  { %271 = vmax.xlane.f32.xlu0 %v270_v43  ;;  %v267_v44 = vsel %vm266_vm3, %v264_v42, -inf }
 0x263   :  { %268 = vmax.xlane.f32.xlu1 %v267_v44 }
 0x264   :  { %v3212_v45 = vpop.f32.mrb[4].mxu1 }
 0x265   :  { %v468_v46 = vmul.f32 0.35355338, %v3212_v45  ;;  %v458_v47 = vpop.f32.mrb[5].mxu1 }
 0x266   :  { %v467_v48 = vmul.f32 0.35355338, %v458_v47 }
 0x267   :  { %v470_v49 = vadd.f32 %v468_v46, %v4001_v36 }
 0x268   :  { %v469_v50 = vadd.f32 %v467_v48, %v4006_v39 }
 0x269   :  { %v474_v51 = vsel %vm266_vm3, %v470_v49, -inf }
 0x26a   :  { %475 = vmax.xlane.f32.xlu1 %v474_v51  ;;  %v471_v52 = vsel %vm266_vm3, %v469_v50, -inf }
 0x26b   :  { %472 = vmax.xlane.f32.xlu0 %v471_v52 }
 0x26c   :  { %v3236_v53 = vpop.f32.mrb[6].mxu1 }
 0x26d   :  { %v824_v54 = vpop.f32.mrb[7].mxu1  ;;  %v834_v20 = vmul.f32 0.35355338, %v3236_v53 }
 0x26e   :  { %v833_v19 = vmul.f32 0.35355338, %v824_v54 }
 0x26f   :  { %v836_v23 = vadd.f32 %v834_v20, %v4001_v36 }
 0x270   :  { %v835_v22 = vadd.f32 %v833_v19, %v4006_v39 }
 0x271   :  { %v840_v25 = vsel %vm266_vm3, %v836_v23, -inf }
 0x272   :  { %v837_v24 = vsel %vm266_vm3, %v835_v22, -inf }
 0x2ef   :  { %v272_v55 = vpop.xlane.xlu0 %271 }
 0x2f0   :  { %v274_v56 = vsub.f32 %v265_v41, %v272_v55  ;;  %v269_v57 = vpop.xlane.xlu1 %268 }
 0x2f1   :  { %v273_v58 = vsub.f32 %v264_v42, %v269_v57 }
 0x2f2   :  { %v277_v59 = vmul.f32 1.442695, %v274_v56 }
 0x2f3   :  { %v275_v60 = vmul.f32 1.442695, %v273_v58 }
 0x2f4   :  { %3659 = vpow2.f32 %v277_v59 }
 0x2f5   :  { %3661 = vpow2.f32 %v275_v60 }
 0x2f7   :  { %v476_v61 = vpop.xlane.xlu1 %475 }
 0x2f8   :  { %v478_v62 = vsub.f32 %v470_v49, %v476_v61  ;;  %v473_v63 = vpop.xlane.xlu0 %472  ;;  %v167_v61 = vld [vmem:[%s4395_s5 + $0x8] sm:$0xff] }
 0x2f9   :  { %v477_v0 = vsub.f32 %v469_v50, %v473_v63 }
 0x2fa   :  { %v481_v1 = vmul.f32 1.442695, %v478_v62  ;;  %v166_v62 = vld [vmem:[%s4395_s5] sm:$0xff] }
 0x2fb   :  { %v479_v2 = vmul.f32 1.442695, %v477_v0 }
 0x2fc   :  { %3663 = vpow2.f32 %v481_v1 }
 0x2fd   :  { %3665 = vpow2.f32 %v479_v2 }
 0x2fe   :  { %v4016_v3 = vpop.eup %3659 }
 0x2ff   :  { %v3662_v4 = vpop.eup %3661  ;;  %v282_v6 = vsel %vm266_vm3, %v4016_v3, 0.0 }
 0x300   :  { %283 = vadd.xlane.f32.xlu1 %v282_v6  ;;  %v279_v8 = vsel %vm266_vm3, %v3662_v4, 0.0 }
 0x301   :  { %280 = vadd.xlane.f32.xlu0 %v279_v8 }
 0x306   :  { %v4021_v12 = vpop.eup %3663 }
 0x307   :  { %v3666_v13 = vpop.eup %3665  ;;  %v486_v15 = vsel %vm266_vm3, %v4021_v12, 0.0 }
 0x308   :  { %487 = vadd.xlane.f32.xlu1 %v486_v15  ;;  %v483_v18 = vsel %vm266_vm3, %v3666_v13, 0.0 }
 0x309   :  { %484 = vadd.xlane.f32.xlu0 %v483_v18 }
 0x319   :  { %3605 = vrot.lane.b32.xlu1 %v3960_v17, %s3817_s2 }
 0x31d   :  { %3610 = vrot.lane.b32.xlu1 %v3960_v17, %s3818_s28 }
 0x31f   :  { %3600 = vrot.lane.b32.xlu0 %v3960_v17, %s3819_s29 }
 0x321   :  { %1031 = vrot.lane.b32.xlu1 %v3950_v14, %s3820_s30 }
 0x323   :  { %1029 = vrot.lane.b32.xlu0 %v3952_v16, %s3820_s30 }
 0x342   :  { %838 = vmax.xlane.f32.xlu0 %v837_v24 }
 0x345   :  { %841 = vmax.xlane.f32.xlu1 %v840_v25 }
 0x356   :  { %3615 = vrot.lane.b32.xlu1 %v3960_v17, %s3821_s15 }
 0x35a   :  { %3620 = vrot.lane.b32.xlu1 %v3960_v17, %s3822_s16 }
 0x38d   :  { %v284_v16 = vpop.xlane.xlu1 %283 }
 0x38e   :  { %v281_v14 = vpop.xlane.xlu0 %280 }
 0x38f   :  { %3667 = vrcp.f32 %v281_v14 }
 0x390   :  { %3669 = vrcp.f32 %v284_v16 }
 0x395   :  { %v488_v26 = vpop.xlane.xlu1 %487 }
 0x396   :  { %v485_v27 = vpop.xlane.xlu0 %484 }
 0x397   :  { %3671 = vrcp.f32 %v485_v27  ;;  %v168_v27 = vld [vmem:[%s4395_s5 + $0x10] sm:$0xff] }
 0x398   :  { %3673 = vrcp.f32 %v488_v26 }
 0x399   :  { %v3668_v28 = vpop.eup %3667  ;;  %v3606_v29 = vpop.permute.xlu1 %3605 }
 0x39a   :  { %v3601_v30 = vpop.permute.xlu0 %3600  ;;  %v287_v31 = vmul.f32 %v3668_v28, %v3662_v4  ;;  %v3608_v32 = vunpack.i.h.bf16 %v3606_v29  ;;  %v3607_v33 = vunpack.i.l.bf16 %v3606_v29  ;;  %v3670_v38 = vpop.eup %3669 }
 0x39b   :  { %v3603_v34 = vunpack.i.h.bf16 %v3601_v30  ;;  %v3602_v35 = vunpack.i.l.bf16 %v3601_v30  ;;  %v288_v46 = vmul.f32 %v3670_v38, %v4016_v3 }
 0x39c   :  { %3203 = vmatprep.mubr.msk.f32.mxu0 %vm266_vm3, %v287_v31  ;;  %v3436_v43 = vpack.c.bf16 %v3608_v32, %v3607_v33 }
 0x39d   :  { %v3611_v37 = vpop.permute.xlu1 %3610  ;;  %v3426_v17 = vpack.c.bf16 %v3603_v34, %v3602_v35 }
 0x39e   :  { %v3613_v40 = vunpack.i.h.bf16 %v3611_v37  ;;  %v3612_v41 = vunpack.i.l.bf16 %v3611_v37  ;;  %v1030_v42 = vpop.permute.xlu0 %1029 }
 0x39f   :  { %3427 = vmatprep.subr.bf16.mxu0 %v3426_v17  ;;  %3253 = vmatprep.mubr.msk.f32.mxu1 %vm178_vm1, %v1030_v42 }
 0x3a0   :  { %v3450_v44 = vpack.c.bf16 %v3613_v40, %v3612_v41  ;;  %3429 = vmatpush3.bf16.msra.mxu0 %v3426_v17 }
 0x3a1   :  { %v3672_v45 = vpop.eup %3671  ;;  %3437 = vmatprep.subr.bf16.mxu0 %v3436_v43  ;;  %v1032_v50 = vpop.permute.xlu1 %1031 }
 0x3a2   :  { %v3674_v47 = vpop.eup %3673  ;;  %3452 = vmatprep.subr.msk.bf16.mxu1 %vm3976_vm2, %v3450_v44  ;;  %v491_v48 = vmul.f32 %v3672_v45, %v3666_v13 }
 0x3a3   :  { %3204 = vmatmul.mubr.msk.f32.vlgmr.msra.gmra.mrb[0].mxu0 %vm266_vm3, %v288_v46  ;;  %3455 = vmatpush3.bf16.xpose.msk.msra.mxu1 %vm3976_vm2, %v3450_v44  ;;  %v492_v49 = vmul.f32 %v3674_v47, %v4021_v12  ;;  %v169_v44 = vld [vmem:[%s4395_s5 + $0x18] sm:$0xff] }
 0x3a4   :  { %3439 = vmatpush3.bf16.msra.mxu0 %v3436_v43  ;;  %3217 = vmatprep.mubr.msk.f32.mxu0 %vm266_vm3, %v491_v48 }
 0x3a5   :  { %3220 = vmatprep.subr.mxu0 %v167_v61 }
 0x3a7   :  { %3218 = vmatmul.mubr.msk.f32.vlgmr.msra.gmra.mrb[2].mxu0 %vm266_vm3, %v492_v49 }
 0x3a8   :  { %3221 = vmatpush3.msra.mxu0 %v167_v61 }
 0x3a9   :  { %3225 = vmatprep.subr.mxu0 %v166_v62 }
 0x3aa   :  { %3254 = vmatmul.mubr.msk.f32.vlgmr.msra.gmra.mrb[8].mxu1 %vm178_vm1, %v1032_v50 }
 0x3cf   :  { %v839_v51 = vpop.xlane.xlu0 %838 }
 0x3d0   :  { %v843_v52 = vsub.f32 %v835_v22, %v839_v51 }
 0x3d2   :  { %v845_v53 = vmul.f32 1.442695, %v843_v52  ;;  %v842_v54 = vpop.xlane.xlu1 %841 }
 0x3d3   :  { %v844_v55 = vsub.f32 %v836_v23, %v842_v54 }
 0x3d4   :  { %3675 = vpow2.f32 %v845_v53  ;;  %v1318_v53 = vsub.s32 1, %v3939_v9 }
 0x3d5   :  { %v847_v56 = vmul.f32 1.442695, %v844_v55 }
 0x3d6   :  { %v3616_v0 = vpop.permute.xlu1 %3615  ;;  %v1319_v54 = vrot.slane %v3945_v11, %v1318_v53 }
 0x3d7   :  { %3677 = vpow2.f32 %v847_v56  ;;  %v3618_v4 = vunpack.i.h.bf16 %v3616_v0  ;;  %v3617_v6 = vunpack.i.l.bf16 %v3616_v0 }
 0x3d9   :  { %v3446_v13 = vpack.c.bf16 %v3618_v4, %v3617_v6 }
 0x3da   :  { %v3621_v24 = vpop.permute.xlu1 %3620 }
 0x3db   :  { %v3623_v28 = vunpack.i.h.bf16 %v3621_v24  ;;  %v3622_v29 = vunpack.i.l.bf16 %v3621_v24 }
 0x3de   :  { %v3676_v57 = vpop.eup %3675 }
 0x3df   :  { %v849_v58 = vsel %vm266_vm3, %v3676_v57, 0.0 }
 0x3e0   :  { %850 = vadd.xlane.f32.xlu0 %v849_v58 }
 0x3e1   :  { %v3678_v59 = vpop.eup %3677 }
 0x3e2   :  { %v852_v60 = vsel %vm266_vm3, %v3678_v59, 0.0 }
 0x3e4   :  { %853 = vadd.xlane.f32.xlu0 %v852_v60 }
 0x46d   :  { %v851_v63 = vpop.xlane.xlu0 %850 }
 0x46e   :  { %3679 = vrcp.f32 %v851_v63 }
 0x471   :  { %v854_v2 = vpop.xlane.xlu0 %853 }
 0x472   :  { %3681 = vrcp.f32 %v854_v2 }
 0x476   :  { %v3205_v1 = vpop.f32.mrb[0].mxu0 }
 0x477   :  { %v367_v3 = vpop.f32.mrb[1].mxu0 }
 0x478   :  { %v3680_v22 = vpop.eup %3679 }
 0x479   :  { %v857_v26 = vmul.f32 %v3680_v22, %v3676_v57  ;;  %v1452_v22 = vld [vmem:[%s4397_s7] sm:$0xff] }
 0x47a   :  { %v3219_v8 = vpop.f32.mrb[2].mxu0 }
 0x47b   :  { %v571_v12 = vpop.f32.mrb[3].mxu0 }
 0x47c   :  { %3222 = vmatprep.mubr.msk.f32.mxu0 %vm178_vm1, %v571_v12  ;;  %v3682_v16 = vpop.eup %3681 }
 0x47d   :  { %3223 = vmatmul.mubr.msk.f32.vlgmr.msra.gmra.mrb[4].mxu0 %vm178_vm1, %v3219_v8  ;;  %v3255_v15 = vpop.f32.mrb[8].mxu1 }
 0x47e   :  { %3226 = vmatpush3.msra.mxu0 %v166_v62  ;;  %3227 = vmatprep.mubr.msk.f32.mxu0 %vm178_vm1, %v367_v3  ;;  %v1111_v18 = vpop.f32.mrb[9].mxu1  ;;  %v1121_v19 = vmul.f32 0.35355338, %v3255_v15 }
 0x47f   :  { %3447 = vmatprep.subr.bf16.mxu0 %v3446_v13  ;;  %v1120_v20 = vmul.f32 0.35355338, %v1111_v18  ;;  %v1365_v18 = vld [vmem:[%s4396_s6 + $0x10] sm:$0xff] }
 0x480   :  { %v1123_v14 = vadd.f32 %v1121_v19, %v4001_v36  ;;  %v3456_v36 = vpack.c.bf16 %v3623_v28, %v3622_v29  ;;  %v1366_v19 = vld [vmem:[%s4396_s6 + $0x18] sm:$0xff]  ;;  %v1353_v29 = vsub.s32 7, %v3939_v9 }
 0x481   :  { %v1122_v23 = vadd.f32 %v1120_v20, %v4006_v39  ;;  %v858_v39 = vmul.f32 %v3682_v16, %v3678_v59  ;;  %v3464_v20 = vpack.c.bf16 %v1366_v19, %v1365_v18 }
 0x482   :  { %v1127_v30 = vsel %vm266_vm3, %v1123_v14, -inf }
 0x483   :  { %v1124_v25 = vsel %vm266_vm3, %v1122_v23, -inf }
 0x484   :  { %1125 = vmax.xlane.f32.xlu0 %v1124_v25 }
 0x485   :  { %3228 = vmatmul.mubr.msk.f32.vlgmr.msra.gmra.mrb[4].mxu0 %vm178_vm1, %v3205_v1 }
 0x486   :  { %3449 = vmatpush3.bf16.msra.mxu0 %v3446_v13  ;;  %3241 = vmatprep.mubr.msk.f32.mxu0 %vm266_vm3, %v857_v26  ;;  %v1364_v13 = vld [vmem:[%s4396_s6 + $0x8] sm:$0xff] }
 0x487   :  { %3244 = vmatprep.subr.mxu0 %v168_v27 }
 0x488   :  { %1128 = vmax.xlane.f32.xlu0 %v1127_v30  ;;  %v1354_v30 = vrot.slane %v3945_v11, %v1353_v29 }
 0x489   :  { %3242 = vmatmul.mubr.msk.f32.vlgmr.msra.gmra.mrb[6].mxu0 %vm266_vm3, %v858_v39  ;;  %v4116_v39 = vld [vmem:[%s4401_s11 + $0x8] sm:$0x1f] }
 0x48a   :  { %3245 = vmatpush3.msra.mxu0 %v168_v27 }
 0x48b   :  { %3457 = vmatprep.subr.bf16.mxu0 %v3456_v36 }
 0x511   :  { %v1126_v31 = vpop.xlane.xlu0 %1125 }
 0x512   :  { %v1130_v32 = vsub.f32 %v1122_v23, %v1126_v31  ;;  %v1453_v23 = vld [vmem:[%s4397_s7 + $0x8] sm:$0xff]  ;;  %v1360_v31 = vrot.slane %v4116_v39, %v82_v10 }
 0x513   :  { %v3468_v24 = vpack.c.bf16 %v1453_v23, %v1452_v22 }
 0x514   :  { %v1132_v33 = vmul.f32 1.442695, %v1130_v32 }
 0x515   :  { %v1129_v34 = vpop.xlane.xlu0 %1128 }
 0x516   :  { %3683 = vpow2.f32 %v1132_v33  ;;  %v1131_v35 = vsub.f32 %v1123_v14, %v1129_v34 }
 0x518   :  { %v1134_v37 = vmul.f32 1.442695, %v1131_v35 }
 0x51a   :  { %3685 = vpow2.f32 %v1134_v37 }
 0x520   :  { %v3684_v17 = vpop.eup %3683 }
 0x521   :  { %v1136_v38 = vsel %vm266_vm3, %v3684_v17, 0.0 }
 0x522   :  { %1137 = vadd.xlane.f32.xlu0 %v1136_v38  ;;  %v1455_v38 = vld [vmem:[%s4397_s7 + $0x18] sm:$0xff] }
 0x524   :  { %v3686_v40 = vpop.eup %3685 }
 0x525   :  { %v1139_v41 = vsel %vm266_vm3, %v3686_v40, 0.0 }
 0x526   :  { %1140 = vadd.xlane.f32.xlu0 %v1139_v41 }
 0x55c   :  { %v3243_v42 = vpop.f32.mrb[6].mxu0 }
 0x55d   :  { %v937_v43 = vpop.f32.mrb[7].mxu0 }
 0x55e   :  { %3246 = vmatprep.mubr.msk.f32.mxu0 %vm178_vm1, %v937_v43  ;;  %v73_v43 = vld [vmem:[#allocation5 + $0x8] sm:$0xff] }
 0x55f   :  { %3247 = vmatmul.mubr.msk.f32.vlgmr.msra.gmra.mrb[4].mxu0 %vm178_vm1, %v3243_v42  ;;  %v72_v42 = vld [vmem:[#allocation5] sm:$0xff] }
 0x560   :  { %3459 = vmatpush3.bf16.msra.mxu0 %v3456_v36 }
 0x561   :  { %3263 = vmatprep.subr.mxu0 %v169_v44 }
 0x5af   :  { %v1138_v45 = vpop.xlane.xlu0 %1137 }
 0x5b0   :  { %3687 = vrcp.f32 %v1138_v45 }
 0x5b3   :  { %v1141_v46 = vpop.xlane.xlu0 %1140 }
 0x5b4   :  { %3689 = vrcp.f32 %v1141_v46 }
 0x5ba   :  { %v3688_v47 = vpop.eup %3687 }
 0x5bb   :  { %v1144_v48 = vmul.f32 %v3688_v47, %v3684_v17  ;;  %v1454_v17 = vld [vmem:[%s4397_s7 + $0x10] sm:$0xff] }
 0x5bc   :  { %v3472_v10 = vpack.c.bf16 %v1455_v38, %v1454_v17 }
 0x5bd   :  { %3260 = vmatprep.mubr.msk.f32.mxu0 %vm266_vm3, %v1144_v48  ;;  %v1458_v48 = vsub.s32 3, %v3939_v9 }
 0x5be   :  { %v3690_v49 = vpop.eup %3689 }
 0x5bf   :  { %v1145_v50 = vmul.f32 %v3690_v49, %v3686_v40 }
 0x5c1   :  { %3261 = vmatmul.mubr.msk.f32.vlgmr.msra.gmra.mrb[8].mxu0 %vm266_vm3, %v1145_v50  ;;  %v1459_v50 = vrot.slane %v3945_v11, %v1458_v48 }
 0x5c2   :  { %3264 = vmatpush3.msra.mxu0 %v169_v44  ;;  %v1369_v44 = vsub.s32 2, %v3939_v9 }
 0x5c4   :  { %v1370_v45 = vrot.slane %v3945_v11, %v1369_v44 }
 0x694   :  { %v3262_v51 = vpop.f32.mrb[8].mxu0 }
 0x695   :  { %v1224_v52 = vpop.f32.mrb[9].mxu0 }
 0x696   :  { %3265 = vmatprep.mubr.msk.f32.mxu0 %vm178_vm1, %v1224_v52 }
 0x697   :  { %3266 = vmatmul.mubr.msk.f32.vlgmr.msra.gmra.mrb[4].mxu0 %vm178_vm1, %v3262_v51 }
 0x76a   :  { %v3267_v55 = vpop.f32.mrb[4].mxu0 }
 0x76b   :  { %v1321_v56 = vadd.f32 %v3267_v55, %v1319_v54  ;;  %v1305_v57 = vpop.f32.mrb[5].mxu0 }
 0x76c   :  { %v1320_v58 = vadd.f32 %v1319_v54, %v1305_v57 }
 0x76d   :  { %v1323_v59 = vadd.f32 %v1321_v56, %v3935_v7 }
 0x76e   :  { %v1322_v60 = vadd.f32 %v1320_v58, %v3931_v5  ;;  %v1363_v5 = vld [vmem:[%s4396_s6] sm:$0xff] }
 0x76f   :  { %v1327_v61 = vsel %vm84_vm0, %v1323_v59, 0.0  ;;  %v3460_v15 = vpack.c.bf16 %v1364_v13, %v1363_v5  ;;  %v4192_v13 = vld [vmem:[%s4393_s3] sm:$0xff] }
 0x770   :  { %1328 = vadd.xlane.f32.xlu1 %v1327_v61  ;;  %v1324_v62 = vsel %vm84_vm0, %v1322_v60, 0.0 }
 0x771   :  { %1325 = vadd.xlane.f32.xlu0 %v1324_v62  ;;  %3461 = vmatprep.subr.bf16.mxu1 %v3460_v15 }
 0x772   :  { %3463 = vmatpush3.bf16.msra.mxu1 %v3460_v15 }
 0x773   :  { %3465 = vmatprep.subr.bf16.mxu1 %v3464_v20 }
 0x776   :  { %3467 = vmatpush3.bf16.msra.mxu1 %v3464_v20 }
 0x777   :  { %3469 = vmatprep.subr.bf16.mxu1 %v3468_v24 }
 0x7fd   :  { %v1329_v63 = vpop.xlane.xlu1 %1328 }
 0x7fe   :  { %v1332_v0 = vmul.f32 0.03125, %v1329_v63  ;;  %v1326_v1 = vpop.xlane.xlu0 %1325 }
 0x7ff   :  { %v1331_v2 = vmul.f32 0.03125, %v1326_v1 }
 0x800   :  { %v1334_v3 = vsub.f32 %v1323_v59, %v1332_v0 }
 0x801   :  { %v1333_v4 = vsub.f32 %v1322_v60, %v1331_v2 }
 0x802   :  { %v1336_v12 = vmul.f32 %v1334_v3, %v1334_v3 }
 0x803   :  { %v1335_v6 = vmul.f32 %v1333_v4, %v1333_v4 }
 0x804   :  { %v1340_v7 = vsel %vm84_vm0, %v1336_v12, 0.0  ;;  %v4187_v12 = vld [vmem:[%s4393_s3 + $0x8] sm:$0xff] }
 0x805   :  { %v1337_v8 = vsel %vm84_vm0, %v1335_v6, 0.0 }
 0x806   :  { %1338 = vadd.xlane.f32.xlu0 %v1337_v8 }
 0x80a   :  { %1341 = vadd.xlane.f32.xlu0 %v1340_v7 }
 0x893   :  { %v1339_v25 = vpop.xlane.xlu0 %1338 }
 0x894   :  { %v1343_v14 = vmul.f32 0.03125, %v1339_v25 }
 0x896   :  { %v1345_v16 = vadd.f32 1e-05, %v1343_v14 }
 0x897   :  { %v1342_v26 = vpop.xlane.xlu0 %1341 }
 0x898   :  { %3691 = vrsqrt.f32 %v1345_v16  ;;  %v1344_v27 = vmul.f32 0.03125, %v1342_v26 }
 0x89a   :  { %v1346_v28 = vadd.f32 1e-05, %v1344_v27 }
 0x89c   :  { %3693 = vrsqrt.f32 %v1346_v28 }
 0x8a2   :  { %v3692_v36 = vpop.eup %3691 }
 0x8a3   :  { %v1349_v32 = vmul.f32 %v3692_v36, %v1333_v4 }
 0x8a5   :  { %v1355_v33 = vmul.f32 %v1354_v30, %v1349_v32 }
 0x8a6   :  { %v3694_v34 = vpop.eup %3693 }
 0x8a7   :  { %v1350_v35 = vmul.f32 %v3694_v34, %v1334_v3  ;;  %v4122_v37 = vadd.f32 %v1360_v31, %v1355_v33 }
 0x8a9   :  { %v1356_v40 = vmul.f32 %v1354_v30, %v1350_v35  ;;  %3276 = vmatprep.mubr.msk.f32.mxu1 %vm84_vm0, %v4122_v37 }
 0x8ab   :  { %v4132_v41 = vadd.f32 %v1360_v31, %v1356_v40 }
 0x8ad   :  { %3277 = vmatmul.mubr.msk.f32.vlgmr.msra.gmra.mrb[10].mxu1 %vm84_vm0, %v4132_v41 }
 0x8ae   :  { %3471 = vmatpush3.bf16.msra.mxu1 %v3468_v24  ;;  %3287 = vmatprep.mubr.msk.f32.mxu1 %vm84_vm0, %v72_v42 }
 0x8af   :  { %3473 = vmatprep.subr.bf16.mxu1 %v3472_v10 }
 0x8b2   :  { %3475 = vmatpush3.bf16.msra.mxu1 %v3472_v10 }
 0x8b5   :  { %3288 = vmatmul.mubr.msk.f32.vlgmr.msra.gmra.mrb[12].mxu1 %vm84_vm0, %v73_v43 }
 0x980   :  { %v3278_v46 = vpop.f32.mrb[10].mxu1 }
 0x981   :  { %v1443_v47 = vpop.f32.mrb[11].mxu1  ;;  %v4162_v11 = vadd.f32 %v3278_v46, %v1370_v45 }
 0x982   :  { %v4143_v49 = vadd.f32 %v1443_v47, %v1370_v45 }
 0x984   :  { %3294 = vmatprep.mubr.msk.f32.mxu1 %vm178_vm1, %v4143_v49 }
 0x988   :  { %v3289_v51 = vpop.f32.mrb[12].mxu1 }
 0x989   :  { %v1538_v52 = vadd.f32 %v3289_v51, %v1459_v50  ;;  %v1532_v54 = vpop.f32.mrb[13].mxu1 }
 0x98a   :  { %v1533_v55 = vadd.f32 %v1532_v54, %v1459_v50 }
 0x98c   :  { %v4150_v56 = vpack.i.bf16 %v1538_v52, %v1533_v55  ;;  %v3476_v57 = vpack.c.bf16 %v1538_v52, %v1533_v55 }
 0x98e   :  { %3630 = vrot.lane.b32.xlu1 %v4150_v56, %s3815_s24  ;;  %3625 = vrot.lane.b32.xlu0 %v4150_v56, %s3812_s20 }
 0x98f   :  { %3478 = vmatprep.subr.msk.bf16.mxu1 %vm3976_vm2, %v3476_v57 }
 0x990   :  { %3481 = vmatpush3.bf16.xpose.msk.msra.mxu1 %vm3976_vm2, %v3476_v57 }
 0x992   :  { %1747 = vrot.lane.b32.xlu0 %v4143_v49, %s3812_s20 }
 0x996   :  { %1749 = vrot.lane.b32.xlu0 %v4162_v11, %s3812_s20 }
 0x997   :  { %3295 = vmatmul.mubr.msk.f32.vlgmr.msra.gmra.mrb[14].mxu1 %vm178_vm1, %v4162_v11 }
 0x99a   :  { %2113 = vrot.lane.b32.xlu0 %v4143_v49, %s3815_s24 }
 0x99e   :  { %2115 = vrot.lane.b32.xlu0 %v4162_v11, %s3815_s24 }
 0xa00   :  { %v3631_v58 = vpop.permute.xlu1 %3630  ;;  %v3626_v59 = vpop.permute.xlu0 %3625 }
 0xa01   :  { %v3633_v60 = vunpack.i.h.bf16 %v3631_v58  ;;  %v3632_v61 = vunpack.i.l.bf16 %v3631_v58  ;;  %v3628_v62 = vunpack.i.h.bf16 %v3626_v59  ;;  %v3627_v63 = vunpack.i.l.bf16 %v3626_v59 }
 0xa03   :  { %v3486_v0 = vpack.c.bf16 %v3628_v62, %v3627_v63  ;;  %v3496_v2 = vpack.c.bf16 %v3633_v60, %v3632_v61 }
 0xa04   :  { %v1748_v1 = vpop.permute.xlu0 %1747 }
 0xa05   :  { %3488 = vmatprep.subr.msk.bf16.mxu1 %vm3976_vm2, %v3486_v0  ;;  %3308 = vmatprep.mubr.msk.f32.mxu1 %vm178_vm1, %v1748_v1 }
 0xa06   :  { %3491 = vmatpush3.bf16.xpose.msk.msra.mxu1 %vm3976_vm2, %v3486_v0 }
 0xa07   :  { %3498 = vmatprep.subr.msk.bf16.mxu1 %vm3976_vm2, %v3496_v2 }
 0xa08   :  { %v1750_v3 = vpop.permute.xlu0 %1749 }
 0xa0c   :  { %v2114_v4 = vpop.permute.xlu0 %2113 }
 0xa0d   :  { %3309 = vmatmul.mubr.msk.f32.vlgmr.msra.gmra.mrb[16].mxu1 %vm178_vm1, %v1750_v3 }
 0xa0e   :  { %3501 = vmatpush3.bf16.xpose.msk.msra.mxu1 %vm3976_vm2, %v3496_v2  ;;  %3332 = vmatprep.mubr.msk.f32.mxu1 %vm178_vm1, %v2114_v4 }
 0xa10   :  { %v2116_v6 = vpop.permute.xlu0 %2115 }
 0xa15   :  { %3333 = vmatmul.mubr.msk.f32.vlgmr.msra.gmra.mrb[18].mxu1 %vm178_vm1, %v2116_v6 }
 0xa6a   :  { %v3296_v8 = vpop.f32.mrb[14].mxu1 }
 0xa6b   :  { %v1635_v7 = vmul.f32 0.35355338, %v3296_v8  ;;  %v1625_v5 = vpop.f32.mrb[15].mxu1 }
 0xa6c   :  { %v1634_v15 = vmul.f32 0.35355338, %v1625_v5 }
 0xa6d   :  { %v1637_v18 = vadd.f32 %v1635_v7, %v4187_v12 }
 0xa6e   :  { %v1636_v19 = vadd.f32 %v1634_v15, %v4192_v13 }
 0xa6f   :  { %v1641_v20 = vsel %vm266_vm3, %v1637_v18, -inf }
 0xa70   :  { %1642 = vmax.xlane.f32.xlu1 %v1641_v20  ;;  %v1638_v22 = vsel %vm266_vm3, %v1636_v19, -inf }
 0xa71   :  { %1639 = vmax.xlane.f32.xlu0 %v1638_v22 }
 0xae0   :  { %v3310_v23 = vpop.f32.mrb[16].mxu1 }
 0xae1   :  { %v1829_v24 = vpop.f32.mrb[17].mxu1  ;;  %v1839_v25 = vmul.f32 0.35355338, %v3310_v23 }
 0xae2   :  { %v1838_v14 = vmul.f32 0.35355338, %v1829_v24 }
 0xae3   :  { %v1841_v27 = vadd.f32 %v1839_v25, %v4187_v12 }
 0xae4   :  { %v1840_v16 = vadd.f32 %v1838_v14, %v4192_v13 }
 0xae5   :  { %v1845_v30 = vsel %vm266_vm3, %v1841_v27, -inf }
 0xae6   :  { %v1842_v26 = vsel %vm266_vm3, %v1840_v16, -inf }
 0xae7   :  { %1843 = vmax.xlane.f32.xlu0 %v1842_v26 }
 0xae8   :  { %v3334_v28 = vpop.f32.mrb[18].mxu1 }
 0xae9   :  { %v2195_v29 = vpop.f32.mrb[19].mxu1  ;;  %v2205_v62 = vmul.f32 0.35355338, %v3334_v28 }
 0xaea   :  { %v2204_v60 = vmul.f32 0.35355338, %v2195_v29 }
 0xaeb   :  { %1846 = vmax.xlane.f32.xlu0 %v1845_v30  ;;  %v2207_v0 = vadd.f32 %v2205_v62, %v4187_v12 }
 0xaec   :  { %v2206_v61 = vadd.f32 %v2204_v60, %v4192_v13 }
 0xaed   :  { %v2211_v1 = vsel %vm266_vm3, %v2207_v0, -inf }
 0xaee   :  { %v2208_v63 = vsel %vm266_vm3, %v2206_v61, -inf }
 0xafd   :  { %v1643_v36 = vpop.xlane.xlu1 %1642 }
 0xafe   :  { %v1645_v31 = vsub.f32 %v1637_v18, %v1643_v36  ;;  %v1640_v32 = vpop.xlane.xlu0 %1639 }
 0xaff   :  { %v1644_v33 = vsub.f32 %v1636_v19, %v1640_v32 }
 0xb00   :  { %v1648_v34 = vmul.f32 1.442695, %v1645_v31 }
 0xb01   :  { %v1646_v35 = vmul.f32 1.442695, %v1644_v33 }
 0xb02   :  { %3695 = vpow2.f32 %v1648_v34 }
 0xb03   :  { %3697 = vpow2.f32 %v1646_v35 }
 0xb0c   :  { %v3696_v17 = vpop.eup %3695 }
 0xb0d   :  { %v3698_v38 = vpop.eup %3697  ;;  %v1653_v40 = vsel %vm266_vm3, %v3696_v17, 0.0 }
 0xb0e   :  { %1654 = vadd.xlane.f32.xlu1 %v1653_v40  ;;  %v1650_v10 = vsel %vm266_vm3, %v3698_v38, 0.0  ;;  %v1541_v40 = vld [vmem:[%s4398_s8] sm:$0xff] }
 0xb0f   :  { %1651 = vadd.xlane.f32.xlu0 %v1650_v10 }
 0xb74   :  { %v1844_v42 = vpop.xlane.xlu0 %1843 }
 0xb75   :  { %v1848_v43 = vsub.f32 %v1840_v16, %v1844_v42 }
 0xb77   :  { %v1850_v45 = vmul.f32 1.442695, %v1848_v43 }
 0xb78   :  { %v1847_v46 = vpop.xlane.xlu0 %1846 }
 0xb79   :  { %3699 = vpow2.f32 %v1850_v45  ;;  %v1849_v47 = vsub.f32 %v1841_v27, %v1847_v46 }
 0xb7b   :  { %v1852_v50 = vmul.f32 1.442695, %v1849_v47 }
 0xb7d   :  { %3701 = vpow2.f32 %v1852_v50 }
 0xb83   :  { %v3700_v51 = vpop.eup %3699 }
 0xb84   :  { %v1854_v52 = vsel %vm266_vm3, %v3700_v51, 0.0 }
 0xb85   :  { %1855 = vadd.xlane.f32.xlu0 %v1854_v52 }
 0xb87   :  { %v3702_v54 = vpop.eup %3701 }
 0xb88   :  { %v1857_v55 = vsel %vm266_vm3, %v3702_v54, 0.0 }
 0xb89   :  { %1858 = vadd.xlane.f32.xlu1 %v1857_v55 }
 0xb9a   :  { %3640 = vrot.lane.b32.xlu1 %v4150_v56, %s3814_s23 }
 0xb9b   :  { %3635 = vrot.lane.b32.xlu0 %v4150_v56, %s3813_s21 }
 0xb9c   :  { %v1652_v57 = vpop.xlane.xlu0 %1651 }
 0xb9d   :  { %3703 = vrcp.f32 %v1652_v57 }
 0xb9e   :  { %3645 = vrot.lane.b32.xlu1 %v4150_v56, %s3820_s30 }
 0xb9f   :  { %2400 = vrot.lane.b32.xlu0 %v4143_v49, %s3820_s30  ;;  %v1655_v49 = vpop.xlane.xlu1 %1654 }
 0xba0   :  { %3705 = vrcp.f32 %v1655_v49 }
 0xba2   :  { %2402 = vrot.lane.b32.xlu1 %v4162_v11, %s3820_s30 }
 0xba7   :  { %v3704_v58 = vpop.eup %3703 }
 0xba8   :  { %v1658_v59 = vmul.f32 %v3704_v58, %v3698_v38 }
 0xbaa   :  { %3301 = vmatprep.mubr.msk.f32.mxu0 %vm266_vm3, %v1658_v59  ;;  %v3706_v7 = vpop.eup %3705 }
 0xbab   :  { %v1659_v20 = vmul.f32 %v3706_v7, %v3696_v17 }
 0xbbe   :  { %2209 = vmax.xlane.f32.xlu0 %v2208_v63 }
 0xbc6   :  { %2212 = vmax.xlane.f32.xlu1 %v2211_v1 }
 0xbd7   :  { %3650 = vrot.lane.b32.xlu1 %v4150_v56, %s3816_s25 }
 0xbdb   :  { %3655 = vrot.lane.b32.xlu1 %v4150_v56, %s3818_s28 }
 0xc12   :  { %v1856_v11 = vpop.xlane.xlu0 %1855 }
 0xc13   :  { %3707 = vrcp.f32 %v1856_v11 }
 0xc16   :  { %v1859_v2 = vpop.xlane.xlu1 %1858  ;;  %v3636_v3 = vpop.permute.xlu0 %3635 }
 0xc17   :  { %3709 = vrcp.f32 %v1859_v2  ;;  %v3638_v4 = vunpack.i.h.bf16 %v3636_v3  ;;  %v3637_v6 = vunpack.i.l.bf16 %v3636_v3 }
 0xc19   :  { %v3482_v8 = vpack.c.bf16 %v3638_v4, %v3637_v6 }
 0xc1a   :  { %v3641_v5 = vpop.permute.xlu1 %3640  ;;  %v2401_v15 = vpop.permute.xlu0 %2400 }
 0xc1b   :  { %v3643_v18 = vunpack.i.h.bf16 %v3641_v5  ;;  %v3642_v19 = vunpack.i.l.bf16 %v3641_v5  ;;  %3483 = vmatprep.subr.bf16.mxu0 %v3482_v8  ;;  %3351 = vmatprep.mubr.msk.f32.mxu1 %vm178_vm1, %v2401_v15 }
 0xc1c   :  { %3485 = vmatpush3.bf16.msra.mxu0 %v3482_v8 }
 0xc1d   :  { %v3708_v56 = vpop.eup %3707  ;;  %v3492_v22 = vpack.c.bf16 %v3643_v18, %v3642_v19 }
 0xc1e   :  { %v3646_v23 = vpop.permute.xlu1 %3645  ;;  %v1862_v24 = vmul.f32 %v3708_v56, %v3700_v51 }
 0xc1f   :  { %v3648_v25 = vunpack.i.h.bf16 %v3646_v23  ;;  %v3647_v14 = vunpack.i.l.bf16 %v3646_v23  ;;  %3302 = vmatmul.mubr.msk.f32.vlgmr.msra.gmra.mrb[10].mxu0 %vm266_vm3, %v1659_v20  ;;  %3493 = vmatprep.subr.bf16.mxu0 %v3492_v22 }
 0xc20   :  { %3495 = vmatpush3.bf16.msra.mxu0 %v3492_v22  ;;  %3315 = vmatprep.mubr.msk.f32.mxu0 %vm266_vm3, %v1862_v24 }
 0xc21   :  { %v3710_v16 = vpop.eup %3709  ;;  %v3506_v26 = vpack.c.bf16 %v3648_v25, %v3647_v14  ;;  %3318 = vmatprep.subr.mxu0 %v1542_v21  ;;  %v1544_v25 = vld [vmem:[%s4398_s8 + $0x18] sm:$0xff] }
 0xc22   :  { %v1863_v27 = vmul.f32 %v3710_v16, %v3702_v54  ;;  %v2403_v28 = vpop.permute.xlu1 %2402 }
 0xc23   :  { %3508 = vmatprep.subr.msk.bf16.mxu1 %vm3976_vm2, %v3506_v26 }
 0xc24   :  { %3316 = vmatmul.mubr.msk.f32.vlgmr.msra.gmra.mrb[12].mxu0 %vm266_vm3, %v1863_v27  ;;  %3511 = vmatpush3.bf16.xpose.msk.msra.mxu1 %vm3976_vm2, %v3506_v26 }
 0xc25   :  { %3319 = vmatpush3.msra.mxu0 %v1542_v21 }
 0xc26   :  { %3323 = vmatprep.subr.mxu0 %v1541_v40 }
 0xc2b   :  { %3352 = vmatmul.mubr.msk.f32.vlgmr.msra.gmra.mrb[20].mxu1 %vm178_vm1, %v2403_v28 }
 0xc4b   :  { %v2210_v29 = vpop.xlane.xlu0 %2209 }
 0xc4c   :  { %v2214_v30 = vsub.f32 %v2206_v61, %v2210_v29 }
 0xc4e   :  { %v2216_v36 = vmul.f32 1.442695, %v2214_v30 }
 0xc50   :  { %3711 = vpow2.f32 %v2216_v36 }
 0xc53   :  { %v2213_v31 = vpop.xlane.xlu1 %2212 }
 0xc54   :  { %v2215_v32 = vsub.f32 %v2207_v0, %v2213_v31  ;;  %v1543_v0 = vld [vmem:[%s4398_s8 + $0x10] sm:$0xff]  ;;  %v2689_v31 = vsub.s32 4, %v3939_v9 }
 0xc56   :  { %v2218_v33 = vmul.f32 1.442695, %v2215_v32  ;;  %v4270_v32 = vld [vmem:[%s4401_s11] sm:$0xff] }
 0xc57   :  { %v3651_v43 = vpop.permute.xlu1 %3650 }
 0xc58   :  { %3713 = vpow2.f32 %v2218_v33  ;;  %v3653_v47 = vunpack.i.h.bf16 %v3651_v43  ;;  %v3652_v50 = vunpack.i.l.bf16 %v3651_v43  ;;  %v2690_v33 = vrot.slane %v4270_v32, %v2689_v31 }
 0xc5a   :  { %v3712_v34 = vpop.eup %3711  ;;  %v3502_v54 = vpack.c.bf16 %v3653_v47, %v3652_v50 }
 0xc5b   :  { %v2220_v35 = vsel %vm266_vm3, %v3712_v34, 0.0  ;;  %v3656_v58 = vpop.permute.xlu1 %3655 }
 0xc5c   :  { %2221 = vadd.xlane.f32.xlu0 %v2220_v35  ;;  %v3658_v1 = vunpack.i.h.bf16 %v3656_v58  ;;  %v3657_v49 = vunpack.i.l.bf16 %v3656_v58 }
 0xc5e   :  { %v3512_v6 = vpack.c.bf16 %v3658_v1, %v3657_v49  ;;  %v2827_v49 = vld [vmem:[%s4400_s10 + $0x18] sm:$0xff] }
 0xc62   :  { %v3714_v17 = vpop.eup %3713 }
 0xc63   :  { %v2223_v38 = vsel %vm266_vm3, %v3714_v17, 0.0 }
 0xc64   :  { %2224 = vadd.xlane.f32.xlu0 %v2223_v38 }
 0xce9   :  { %v2222_v10 = vpop.xlane.xlu0 %2221 }
 0xcea   :  { %3715 = vrcp.f32 %v2222_v10 }
 0xcf1   :  { %v2225_v46 = vpop.xlane.xlu0 %2224 }
 0xcf2   :  { %v3303_v42 = vpop.f32.mrb[10].mxu0  ;;  %3717 = vrcp.f32 %v2225_v46 }
 0xcf3   :  { %v1738_v45 = vpop.f32.mrb[11].mxu0 }
 0xcf4   :  { %v3716_v55 = vpop.eup %3715 }
 0xcf5   :  { %v2228_v63 = vmul.f32 %v3716_v55, %v3712_v34  ;;  %v2733_v55 = vld [vmem:[%s4399_s9] sm:$0xff] }
 0xcf7   :  { %v3317_v51 = vpop.f32.mrb[12].mxu0 }
 0xcf8   :  { %v1942_v52 = vpop.f32.mrb[13].mxu0 }
 0xcf9   :  { %3320 = vmatprep.mubr.msk.f32.mxu0 %vm178_vm1, %v1942_v52 }
 0xcfa   :  { %3321 = vmatmul.mubr.msk.f32.vlgmr.msra.gmra.mrb[14].mxu0 %vm178_vm1, %v3317_v51 }
 0xcfb   :  { %3324 = vmatpush3.msra.mxu0 %v1541_v40  ;;  %3325 = vmatprep.mubr.msk.f32.mxu0 %vm178_vm1, %v1738_v45 }
 0xcfc   :  { %3503 = vmatprep.subr.bf16.mxu0 %v3502_v54  ;;  %v3718_v62 = vpop.eup %3717 }
 0xcfd   :  { %v2229_v2 = vmul.f32 %v3718_v62, %v3714_v17  ;;  %v2824_v62 = vld [vmem:[%s4400_s10] sm:$0xff] }
 0xcfe   :  { %v3353_v57 = vpop.f32.mrb[20].mxu1 }
 0xcff   :  { %v2482_v59 = vpop.f32.mrb[21].mxu1  ;;  %v2492_v60 = vmul.f32 0.35355338, %v3353_v57  ;;  %v2734_v57 = vld [vmem:[%s4399_s9 + $0x8] sm:$0xff] }
 0xd00   :  { %v2491_v61 = vmul.f32 0.35355338, %v2482_v59  ;;  %v3516_v58 = vpack.c.bf16 %v2734_v57, %v2733_v55  ;;  %v2735_v59 = vld [vmem:[%s4399_s9 + $0x10] sm:$0xff] }
 0xd01   :  { %v2494_v4 = vadd.f32 %v2492_v60, %v4187_v12  ;;  %v2736_v60 = vld [vmem:[%s4399_s9 + $0x18] sm:$0xff] }
 0xd02   :  { %3326 = vmatmul.mubr.msk.f32.vlgmr.msra.gmra.mrb[14].mxu0 %vm178_vm1, %v3303_v42  ;;  %v2493_v11 = vadd.f32 %v2491_v61, %v4192_v13  ;;  %3517 = vmatprep.subr.bf16.mxu1 %v3516_v58  ;;  %v3520_v61 = vpack.c.bf16 %v2736_v60, %v2735_v59 }
 0xd03   :  { %3505 = vmatpush3.bf16.msra.mxu0 %v3502_v54  ;;  %3339 = vmatprep.mubr.msk.f32.mxu0 %vm266_vm3, %v2228_v63  ;;  %v2498_v8 = vsel %vm266_vm3, %v2494_v4, -inf  ;;  %v2825_v63 = vld [vmem:[%s4400_s10 + $0x8] sm:$0xff] }
 0xd04   :  { %v2495_v3 = vsel %vm266_vm3, %v2493_v11, -inf  ;;  %3342 = vmatprep.subr.mxu0 %v1543_v0  ;;  %3519 = vmatpush3.bf16.msra.mxu1 %v3516_v58  ;;  %v3524_v1 = vpack.c.bf16 %v2825_v63, %v2824_v62 }
 0xd05   :  { %2496 = vmax.xlane.f32.xlu0 %v2495_v3  ;;  %3521 = vmatprep.subr.bf16.mxu1 %v3520_v61  ;;  %v2829_v3 = vld [vmem:[%s4400_s10 + $0x28] sm:$0xff] }
 0xd06   :  { %3340 = vmatmul.mubr.msk.f32.vlgmr.msra.gmra.mrb[16].mxu0 %vm266_vm3, %v2229_v2  ;;  %v2828_v2 = vld [vmem:[%s4400_s10 + $0x20] sm:$0xff] }
 0xd07   :  { %3343 = vmatpush3.msra.mxu0 %v1543_v0  ;;  %v2826_v0 = vld [vmem:[%s4400_s10 + $0x10] sm:$0xff] }
 0xd08   :  { %3513 = vmatprep.subr.bf16.mxu0 %v3512_v6  ;;  %3523 = vmatpush3.bf16.msra.mxu1 %v3520_v61 }
 0xd09   :  { %2499 = vmax.xlane.f32.xlu0 %v2498_v8  ;;  %v2831_v8 = vld [vmem:[%s4400_s10 + $0x38] sm:$0xff] }
 0xd92   :  { %v2497_v7 = vpop.xlane.xlu0 %2496 }
 0xd93   :  { %v2501_v13 = vsub.f32 %v2493_v11, %v2497_v7  ;;  %v3528_v11 = vpack.c.bf16 %v2827_v49, %v2826_v0 }
 0xd95   :  { %v2503_v5 = vmul.f32 1.442695, %v2501_v13  ;;  %v2832_v13 = vld [vmem:[%s4400_s10 + $0x40] sm:$0xff] }
 0xd96   :  { %v2500_v15 = vpop.xlane.xlu0 %2499 }
 0xd97   :  { %3719 = vpow2.f32 %v2503_v5  ;;  %v2502_v18 = vsub.f32 %v2494_v4, %v2500_v15  ;;  %v3532_v4 = vpack.c.bf16 %v2829_v3, %v2828_v2  ;;  %v2833_v5 = vld [vmem:[%s4400_s10 + $0x48] sm:$0xff] }
 0xd98   :  { %v3540_v15 = vpack.c.bf16 %v2833_v5, %v2832_v13 }
 0xd99   :  { %v2505_v19 = vmul.f32 1.442695, %v2502_v18  ;;  %v2834_v18 = vld [vmem:[%s4400_s10 + $0x50] sm:$0xff] }
 0xd9b   :  { %3721 = vpow2.f32 %v2505_v19  ;;  %v2835_v19 = vld [vmem:[%s4400_s10 + $0x58] sm:$0xff] }
 0xda1   :  { %v3720_v56 = vpop.eup %3719 }
 0xda2   :  { %v2507_v12 = vsel %vm266_vm3, %v3720_v56, 0.0 }
 0xda3   :  { %2508 = vadd.xlane.f32.xlu0 %v2507_v12  ;;  %v2836_v12 = vld [vmem:[%s4400_s10 + $0x60] sm:$0xff] }
 0xda5   :  { %v3722_v20 = vpop.eup %3721 }
 0xda6   :  { %v2510_v22 = vsel %vm266_vm3, %v3722_v20, 0.0 }
 0xda7   :  { %2511 = vadd.xlane.f32.xlu0 %v2510_v22 }
 0xdd9   :  { %v3341_v23 = vpop.f32.mrb[16].mxu0 }
 0xdda   :  { %v2308_v24 = vpop.f32.mrb[17].mxu0 }
 0xddb   :  { %3344 = vmatprep.mubr.msk.f32.mxu0 %vm178_vm1, %v2308_v24 }
 0xddc   :  { %3345 = vmatmul.mubr.msk.f32.vlgmr.msra.gmra.mrb[14].mxu0 %vm178_vm1, %v3341_v23 }
 0xddd   :  { %3515 = vmatpush3.bf16.msra.mxu0 %v3512_v6  ;;  %v2830_v6 = vld [vmem:[%s4400_s10 + $0x30] sm:$0xff] }
 0xdde   :  { %3361 = vmatprep.subr.mxu0 %v1544_v25  ;;  %v3536_v7 = vpack.c.bf16 %v2831_v8, %v2830_v6 }
 0xe30   :  { %v2509_v14 = vpop.xlane.xlu0 %2508 }
 0xe31   :  { %3723 = vrcp.f32 %v2509_v14 }
 0xe34   :  { %v2512_v16 = vpop.xlane.xlu0 %2511 }
 0xe35   :  { %3725 = vrcp.f32 %v2512_v16 }
 0xe3b   :  { %v3724_v26 = vpop.eup %3723 }
 0xe3c   :  { %v2515_v27 = vmul.f32 %v3724_v26, %v3720_v56  ;;  %v3544_v56 = vpack.c.bf16 %v2835_v19, %v2834_v18  ;;  %v2956_v19 = vrot.slane %v4116_v39, %v2689_v31 }
 0xe3e   :  { %3358 = vmatprep.mubr.msk.f32.mxu0 %vm266_vm3, %v2515_v27  ;;  %v2724_v27 = vrot.slane %v4116_v39, %v1318_v53  ;;  %v2838_v53 = vld [vmem:[%s4400_s10 + $0x70] sm:$0xff] }
 0xe3f   :  { %v3726_v28 = vpop.eup %3725 }
 0xe40   :  { %v2516_v29 = vmul.f32 %v3726_v28, %v3722_v20  ;;  %v2837_v20 = vld [vmem:[%s4400_s10 + $0x68] sm:$0xff] }
 0xe41   :  { %v3548_v22 = vpack.c.bf16 %v2837_v20, %v2836_v12 }
 0xe42   :  { %3359 = vmatmul.mubr.msk.f32.vlgmr.msra.gmra.mrb[18].mxu0 %vm266_vm3, %v2516_v29  ;;  %v2730_v29 = vrot.slane %v4116_v39, %v1369_v44  ;;  %v2839_v44 = vld [vmem:[%s4400_s10 + $0x78] sm:$0xff]  ;;  %s3823_s10 = smov [#allocation7]  }
 0xe43   :  { %3362 = vmatpush3.msra.mxu0 %v1544_v25  ;;  %s2966_s20 = sshll.u32 %s3823_s10, 4  ;;  %s2967_s20 = int_to_ptr.vmem [resolvable:$true] %s2966_s20 }
 0xe44   :  { %3525 = vmatprep.subr.bf16.mxu0 %v3524_v1  ;;  %s3780_s24 = scalar_lea.vmem %s2967_s20, 256  ;;  %p3785_p3 = scmp.lt.s32.totalorder %s2967_s20, %s2967_s20 }
 0xe45   :  { %p3781_p2 = scmp.ne.s32.totalorder %s2967_s20, %s3780_s24  ;;  %p3786_p4 = scmp.lt.s32.totalorder %s3780_s24, %s3780_s24 }
 0xe47   :  { %p3787_p5 = por %p3786_p4, %p3785_p3 }
 0xe49   :  { %p3788_p6 = pnand %p3787_p5, %p3781_p2 }
 0xf15   :  { %v3360_v30 = vpop.f32.mrb[18].mxu0 }
 0xf16   :  { %v2595_v36 = vpop.f32.mrb[19].mxu0 }
 0xf17   :  { %3363 = vmatprep.mubr.msk.f32.mxu0 %vm178_vm1, %v2595_v36 }
 0xf18   :  { %3364 = vmatmul.mubr.msk.f32.vlgmr.msra.gmra.mrb[14].mxu0 %vm178_vm1, %v3360_v30 }
 0xf19   :  { %3527 = vmatpush3.bf16.msra.mxu0 %v3524_v1 }
 0xf1a   :  { %3529 = vmatprep.subr.bf16.mxu0 %v3528_v11 }
 0xf1d   :  { %3531 = vmatpush3.bf16.msra.mxu0 %v3528_v11 }
 0xf1e   :  { %3533 = vmatprep.subr.bf16.mxu0 %v3532_v4 }
 0xf21   :  { %3535 = vmatpush3.bf16.msra.mxu0 %v3532_v4 }
 0xf22   :  { %3537 = vmatprep.subr.bf16.mxu0 %v3536_v7 }
 0xf25   :  { %3539 = vmatpush3.bf16.msra.mxu0 %v3536_v7 }
 0xf26   :  { %3541 = vmatprep.subr.bf16.mxu0 %v3540_v15 }
 0xf29   :  { %3543 = vmatpush3.bf16.msra.mxu0 %v3540_v15  ;;  %v2950_v15 = vrot.slane %v4116_v39, %v1458_v48 }
 0xf2a   :  { %3545 = vmatprep.subr.bf16.mxu0 %v3544_v56 }
 0xf2d   :  { %3547 = vmatpush3.bf16.msra.mxu0 %v3544_v56 }
 0xf2e   :  { %3549 = vmatprep.subr.bf16.mxu0 %v3548_v22 }
 0xf31   :  { %3551 = vmatpush3.bf16.msra.mxu0 %v3548_v22 }
 0xfeb   :  { %v3365_v34 = vpop.f32.mrb[14].mxu0 }
 0xfec   :  { %v2692_v35 = vadd.f32 %v3365_v34, %v2690_v33  ;;  %v2676_v17 = vpop.f32.mrb[15].mxu0 }
 0xfed   :  { %v2691_v38 = vadd.f32 %v2690_v33, %v2676_v17 }
 0xfee   :  { %v2694_v21 = vadd.f32 %v2692_v35, %v4132_v41 }
 0xfef   :  { %v2693_v40 = vadd.f32 %v2691_v38, %v4122_v37 }
 0xff0   :  { %v2698_v10 = vsel %vm84_vm0, %v2694_v21, 0.0 }
 0xff1   :  { %2699 = vadd.xlane.f32.xlu1 %v2698_v10  ;;  %v2695_v42 = vsel %vm84_vm0, %v2693_v40, 0.0 }
 0xff2   :  { %2696 = vadd.xlane.f32.xlu0 %v2695_v42 }
0x107e   :  { %v2700_v43 = vpop.xlane.xlu1 %2699 }
0x107f   :  { %v2702_v45 = vmul.f32 0.03125, %v2700_v43  ;;  %v2697_v46 = vpop.xlane.xlu0 %2696 }
0x1080   :  { %v2701_v47 = vmul.f32 0.03125, %v2697_v46 }
0x1081   :  { %v4279_v50 = vsub.f32 %v2694_v21, %v2702_v45  ;;  %v3552_v21 = vpack.c.bf16 %v2839_v44, %v2838_v53 }
0x1082   :  { %v4281_v51 = vsub.f32 %v2693_v40, %v2701_v47  ;;  %v2739_v40 = vsub.s32 5, %v3939_v9 }
0x1083   :  { %v2706_v37 = vmul.f32 %v4279_v50, %v4279_v50  ;;  %3553 = vmatprep.subr.bf16.mxu0 %v3552_v21 }
0x1084   :  { %v2705_v52 = vmul.f32 %v4281_v51, %v4281_v51  ;;  %3555 = vmatpush3.bf16.msra.mxu0 %v3552_v21  ;;  %v2740_v10 = vrot.slane %v4270_v32, %v2739_v40 }
0x1085   :  { %v2710_v54 = vsel %vm84_vm0, %v2706_v37, 0.0 }
0x1086   :  { %v2707_v41 = vsel %vm84_vm0, %v2705_v52, 0.0 }
0x1087   :  { %2708 = vadd.xlane.f32.xlu0 %v2707_v41 }
0x108b   :  { %2711 = vadd.xlane.f32.xlu0 %v2710_v54 }
0x1114   :  { %v2709_v23 = vpop.xlane.xlu0 %2708 }
0x1115   :  { %v2713_v24 = vmul.f32 0.03125, %v2709_v23 }
0x1117   :  { %v2715_v25 = vadd.f32 1e-05, %v2713_v24 }
0x1118   :  { %v2712_v14 = vpop.xlane.xlu0 %2711 }
0x1119   :  { %3727 = vrsqrt.f32 %v2715_v25  ;;  %v2714_v16 = vmul.f32 0.03125, %v2712_v14 }
0x111b   :  { %v2716_v26 = vadd.f32 1e-05, %v2714_v16 }
0x111d   :  { %3729 = vrsqrt.f32 %v2716_v26 }
0x1123   :  { %v3728_v28 = vpop.eup %3727 }
0x1124   :  { %v2719_v30 = vmul.f32 %v3728_v28, %v4281_v51  ;;  %v2842_v51 = vsub.s32 6, %v3939_v9 }
0x1126   :  { %v2725_v36 = vmul.f32 %v2724_v27, %v2719_v30  ;;  %v2843_v52 = vrot.slane %v4270_v32, %v2842_v51 }
0x1127   :  { %v3730_v33 = vpop.eup %3729 }
0x1128   :  { %v2720_v34 = vmul.f32 %v3730_v33, %v4279_v50  ;;  %v2731_v35 = vadd.f32 %v2730_v29, %v2725_v36 }
0x112a   :  { %3374 = vmatprep.mubr.msk.f32.mxu1 %vm84_vm0, %v2731_v35  ;;  %v2726_v17 = vmul.f32 %v2724_v27, %v2720_v34 }
0x112c   :  { %v2732_v38 = vadd.f32 %v2730_v29, %v2726_v17 }
0x112e   :  { %3375 = vmatmul.mubr.msk.f32.vlgmr.msra.gmra.mrb[22].mxu1 %vm84_vm0, %v2732_v38 }
0x1201   :  { %v3376_v42 = vpop.f32.mrb[22].mxu1 }
0x1202   :  { %v2819_v43 = vadd.f32 %v3376_v42, %v2740_v10  ;;  %v2813_v45 = vpop.f32.mrb[23].mxu1 }
0x1203   :  { %v2814_v46 = vadd.f32 %v2813_v45, %v2740_v10 }
0x1204   :  { %v2823_v50 = vmax.f32 %v2819_v43, 0.0 }
0x1205   :  { %v2822_v47 = vmax.f32 %v2814_v46, 0.0 }
0x1207   :  { %3409 = vmatprep.mubr.f32.mxu0 %v2822_v47 }
0x1208   :  { %3410 = vmatmul.mubr.f32.vlgmr.msra.gmra.mrb[20].mxu0 %v2823_v50 }
0x12db   :  { %v3411_v41 = vpop.f32.mrb[20].mxu0 }
0x12dc   :  { %v2910_v37 = vpop.f32.mrb[21].mxu0  ;;  %v2916_v54 = vadd.f32 %v3411_v41, %v2843_v52 }
0x12dd   :  { %v2911_v55 = vadd.f32 %v2910_v37, %v2843_v52 }
0x12de   :  { %v2920_v59 = vadd.f32 %v2916_v54, %v2732_v38 }
0x12df   :  { %v2919_v57 = vadd.f32 %v2911_v55, %v2731_v35 }
0x12e0   :  { %v2924_v60 = vsel %vm84_vm0, %v2920_v59, 0.0 }
0x12e1   :  { %v2921_v58 = vsel %vm84_vm0, %v2919_v57, 0.0 }
0x12e2   :  { %2922 = vadd.xlane.f32.xlu0 %v2921_v58 }
0x12e6   :  { %2925 = vadd.xlane.f32.xlu0 %v2924_v60 }
0x136f   :  { %v2923_v61 = vpop.xlane.xlu0 %2922 }
0x1370   :  { %v2927_v62 = vmul.f32 0.03125, %v2923_v61 }
0x1372   :  { %v2929_v63 = vsub.f32 %v2919_v57, %v2927_v62 }
0x1373   :  { %v2926_v0 = vpop.xlane.xlu0 %2925 }
0x1374   :  { %v2928_v1 = vmul.f32 0.03125, %v2926_v0  ;;  %v2931_v49 = vmul.f32 %v2929_v63, %v2929_v63 }
0x1376   :  { %v2930_v11 = vsub.f32 %v2920_v59, %v2928_v1  ;;  %v2933_v32 = vsel %vm84_vm0, %v2931_v49, 0.0 }
0x1377   :  { %2934 = vadd.xlane.f32.xlu0 %v2933_v32 }
0x1378   :  { %v2932_v2 = vmul.f32 %v2930_v11, %v2930_v11 }
0x137a   :  { %v2936_v3 = vsel %vm84_vm0, %v2932_v2, 0.0 }
0x137b   :  { %2937 = vadd.xlane.f32.xlu0 %v2936_v3 }
0x1404   :  { %v2935_v4 = vpop.xlane.xlu0 %2934 }
0x1405   :  { %v2939_v6 = vmul.f32 0.03125, %v2935_v4 }
0x1407   :  { %v2941_v8 = vadd.f32 1e-05, %v2939_v6 }
0x1408   :  { %v2938_v7 = vpop.xlane.xlu0 %2937 }
0x1409   :  { %3731 = vrsqrt.f32 %v2941_v8  ;;  %v2940_v13 = vmul.f32 0.03125, %v2938_v7 }
0x140b   :  { %v2942_v5 = vadd.f32 1e-05, %v2940_v13 }
0x140d   :  { %3733 = vrsqrt.f32 %v2942_v5 }
0x1413   :  { %v3732_v18 = vpop.eup %3731 }
0x1414   :  { %v2945_v56 = vmul.f32 %v3732_v18, %v2929_v63 }
0x1416   :  { %v2951_v12 = vmul.f32 %v2950_v15, %v2945_v56 }
0x1417   :  { %v3734_v20 = vpop.eup %3733 }
0x1418   :  { %v2946_v22 = vmul.f32 %v3734_v20, %v2930_v11  ;;  %v2957_v23 = vadd.f32 %v2956_v19, %v2951_v12 }
0x141a   :  { %v2952_v24 = vmul.f32 %v2950_v15, %v2946_v22  ;;  %2959 = vst.msk [vmem:[#allocation7] sm:$0xff] %vm84_vm0, %v2957_v23 }
0x141c   :  { %v2958_v25 = vadd.f32 %v2956_v19, %v2952_v24 }
0x141e   :  { %2960 = vst.msk [vmem:[#allocation7 + $0x8] sm:$0xff] %vm84_vm0, %v2958_v25 }
0x141f   :  { %3791 = shalt.err (!%p3788_p6)
}
0x1420   :  { %s3792_s3 = scalar_lea.hbm %s4402_s12, 256 }
0x1421   :  { %p3793_p7 = scmp.ne.s32.totalorder %s4402_s12, %s3792_s3  ;;  %p3796_p8 = scmp.lt.u32.totalorder %s3792_s3, %s4402_s12 }
0x1423   :  { %p3798_p9 = pnand %p3796_p8, %p3793_p7 }
0x1425   :  { %3801 = shalt.err (!%p3798_p9)
}
0x1426   :  { %2972 = dma.vmem_to_hbm [thread:$0]  %s2967_s20, 256, %s4402_s12, [#allocation4], %s3809_s13, %s3809_s13, %s3810_s14  }
0x1427   :  { %3806 = dma.done.wait [#allocation4], 256  }
0x1428   :  { %3807 = vsyncadd [#allocation4], 4294967040 }
0x1429   :  { %2976 = vsyncpa [#allocation3], 1 }
0x142a   :  { %2977 = vsyncpa [#allocation6], 1 }
0x142b   :  { %2978 = vsyncpa [#allocation4], 1 }

</bundles_post_ra>
